<compile_context>
chip_gen: v5e
topology: v5e:2x2
jax: 0.10.0
libtpu: 0.0.40
codegen_flags: <defaults>
</compile_context>

<pallas_src>
import jax
import jax.numpy as jnp
from jax.experimental import pallas as pl
from jax.experimental.pallas import tpu as pltpu

IN_DIM = 784
H1 = 512
H2 = 256
W3_ROWS = 8        # final weight stored as (8, 256); row 0 is the real 256->1 weight
MAX_TB = 1024      # batch-tile cap (multiple of 256); ~14 MB VMEM footprint at 1024


def _leaky_relu(x, slope=0.2):
    return jnp.where(x > 0, x, slope * x)


def _round_up(n, m):
    return ((n + m - 1) // m) * m


def _choose_batch_tile(batch):
    """Batch tile: multiple of 16 (bf16 packs 16 rows per sublane vreg).

    - batch <= 256: single grid step (whole problem in one tile).
    - batch  > 256: at least 2 grid steps so both TensorCores of a v7x chip get
      work through the 'parallel' grid axis, capped at MAX_TB to amortize the
      ~0.35us per-step pipeline overhead.  The cap is overhead/VMEM driven, not
      "fill a 256x256 MXU" (v5e's MXU is 4x128x128 anyway).
    """
    if batch <= 256:
        return _round_up(batch, 16)
    return min(MAX_TB, _round_up(pl.cdiv(batch, 2), 16))


def disc_kernel(x_ref, w1_ref, b1_ref, w2_ref, b2_ref, w3_ref, b3_ref, o_ref):
    # x arrives untouched from HBM as f32 (tb, 784); cast to bf16 in VMEM so the
    # wrapper never makes an extra HBM pad/cast pass.  Mosaic handles the
    # non-128-aligned K=784 contraction (internal lane padding is masked).
    x = x_ref[...].astype(jnp.bfloat16)

    # Layer 1: (tb, 784)bf16 @ (784, 512)bf16 -> f32 acc, + bias, LeakyReLU(0.2)
    h1 = jnp.dot(x, w1_ref[...], preferred_element_type=jnp.float32)
    h1 = _leaky_relu(h1 + b1_ref[...])

    # Layer 2: (tb, 512) @ (512, 256) -> f32 acc, + bias, LeakyReLU(0.2)
    h2 = jnp.dot(h1.astype(jnp.bfloat16), w2_ref[...],
                 preferred_element_type=jnp.float32)
    h2 = _leaky_relu(h2 + b2_ref[...])

    # Layer 3 (256 -> 1): scores[i, b] = sum_k w3r[i, k] * h2[b, k], i.e.
    # w3r @ h2^T, so the logits land directly as a lane-dense (1, tb) row.
    scores = jax.lax.dot_general(
        w3_ref[...], h2.astype(jnp.bfloat16),
        dimension_numbers=(((1,), (1,)), ((), ())),
        preferred_element_type=jnp.float32)            # (8, tb); row 0 is real
    logits = scores[0:1, :] + b3_ref[0]                # (1, tb), f32
    o_ref[0] = jax.nn.sigmoid(logits)                  # sigmoid on tb lanes only


@jax.jit
def discriminator_forward(x, params):
    w1, b1, w2, b2, w3r, b3 = params
    B = x.shape[0]
    tb = _choose_batch_tile(B)
    nt = pl.cdiv(B, tb)

    out = pl.pallas_call(
        disc_kernel,
        out_shape=jax.ShapeDtypeStruct((nt, 1, tb), jnp.float32),
        grid_spec=pltpu.PrefetchScalarGridSpec(
            num_scalar_prefetch=0,
            grid=(nt,),
            in_specs=[
                # x: a single f32 HBM pass; the last block may be partial --
                # its garbage rows only ever feed their own output columns,
                # which the [:B] slice below drops.
                pl.BlockSpec((tb, IN_DIM), lambda i: (i, 0)),
                # Grid-invariant weights/biases: constant index map -> DMA'd
                # once, resident in VMEM across all batch tiles.
                # (pipeline_mode=pl.Buffered(1) could drop their second buffer,
                #  ~1 MB, but VMEM is nowhere near the limit so it is skipped.)
                pl.BlockSpec((IN_DIM, H1), lambda i: (0, 0)),
                pl.BlockSpec((1, H1), lambda i: (0, 0)),
                pl.BlockSpec((H1, H2), lambda i: (0, 0)),
                pl.BlockSpec((1, H2), lambda i: (0, 0)),
                pl.BlockSpec((W3_ROWS, H2), lambda i: (0, 0)),
                # Final bias: single scalar, kept in SMEM.
                pl.BlockSpec(memory_space=pltpu.MemorySpace.SMEM),
            ],
            out_specs=pl.BlockSpec((1, 1, tb), lambda i: (i, 0, 0)),
        ),
        compiler_params=pltpu.CompilerParams(
            dimension_semantics=("parallel",),
            vmem_limit_bytes=48 * 1024 * 1024,
        ),
    )(x, w1, b1, w2, b2, w3r, b3)

    # (nt, 1, tb) lane-dense logit rows -> (B, 1); padded tail columns dropped.
    return out.reshape(nt * tb)[:B].reshape(B, 1)


def init_params(key):
    """Matches the PyTorch init: weight ~ N(0, 0.02), bias = 0 (f32, unpadded)."""
    k1, k2, k3 = jax.random.split(key, 3)
    # Stored as (in, out) = transpose of torch's (out, in); same distribution.
    w1 = 0.02 * jax.random.normal(k1, (IN_DIM, H1), dtype=jnp.float32)
    b1 = jnp.zeros((1, H1), dtype=jnp.float32)
    w2 = 0.02 * jax.random.normal(k2, (H1, H2), dtype=jnp.float32)
    b2 = jnp.zeros((1, H2), dtype=jnp.float32)
    w3 = 0.02 * jax.random.normal(k3, (H2, 1), dtype=jnp.float32)
    b3 = jnp.zeros((1, 1), dtype=jnp.float32)
    return (w1, b1, w2, b2, w3, b3)


def pack_params(params):
    """f32 reference params -> kernel params.

    Weights go to bf16 (MXU-native); biases stay f32.  The 256->1 weight is
    stored as an (8, 256) row block (row 0 real, rest zero) for the lane-dense
    w3 @ h2^T head matmul; the final bias becomes a (1,) SMEM scalar.
    # TODO(synk): optionally quantize w1/x to fp8 (e4m3) on v7x only.
    """
    w1, b1, w2, b2, w3, b3 = params
    w3r = jnp.zeros((W3_ROWS, H2), jnp.float32).at[0, :].set(w3[:, 0])
    return (w1.astype(jnp.bfloat16), b1,
            w2.astype(jnp.bfloat16), b2,
            w3r.astype(jnp.bfloat16), b3.reshape(-1))


def reference_forward(x, params):
    """Pure-JAX f32 reference of the PyTorch forward."""
    w1, b1, w2, b2, w3, b3 = params
    h = _leaky_relu(x @ w1 + b1)
    h = _leaky_relu(h @ w2 + b2)
    return jax.nn.sigmoid(h @ w3 + b3)


if __name__ == "__main__":
    key = jax.random.PRNGKey(0)
    kx, kp = jax.random.split(key)

    params = init_params(kp)
    kparams = pack_params(params)

    # Small batch: exercises the partial 16-row tile, single grid step.
    x_small = jax.random.normal(kx, (4, IN_DIM), dtype=jnp.float32)
    out_small = jax.block_until_ready(discriminator_forward(x_small, kparams))
    ref_small = reference_forward(x_small, params)
    assert out_small.shape == (4, 1), out_small.shape
    assert jnp.allclose(out_small, ref_small, atol=2e-2), "small-batch mismatch"

    # Larger batch: two 256-row tiles -> 2-step parallel grid (both TCs on v7x).
    x_big = jax.random.normal(kx, (512, IN_DIM), dtype=jnp.float32)
    out_big = jax.block_until_ready(discriminator_forward(x_big, kparams))
    ref_big = reference_forward(x_big, params)
    assert out_big.shape == (512, 1), out_big.shape
    assert jnp.allclose(out_big, ref_big, atol=2e-2), "large-batch mismatch"

    print("KERNEL_OK")
</pallas_src>

<mosaic_0001>
module attributes {stable_mosaic.version = 11 : i64} {
  func.func @disc_kernel(%arg0: i32, %arg1: memref<16x784xf32, #tpu.memory_space<vmem>>, %arg2: memref<784x512xbf16, #tpu.memory_space<vmem>>, %arg3: memref<1x512xf32, #tpu.memory_space<vmem>>, %arg4: memref<512x256xbf16, #tpu.memory_space<vmem>>, %arg5: memref<1x256xf32, #tpu.memory_space<vmem>>, %arg6: memref<8x256xbf16, #tpu.memory_space<vmem>>, %arg7: memref<1xf32, #tpu.memory_space<smem>>, %arg8: memref<1x1x16xf32, #tpu.memory_space<vmem>>) attributes {dimension_semantics = [#tpu.dimension_semantics<parallel>], iteration_bounds = array<i64: 1>, scalar_prefetch = 0 : i64, scratch_operands = 0 : i64, tpu.core_type = #tpu.core_type<tc>, window_params = [{transform_indices = @transform_0, window_bounds = array<i64: 16, 784>}, {pipeline_mode = #tpu.pipeline_mode<synchronous>, transform_indices = @transform_1, window_bounds = array<i64: 784, 512>}, {pipeline_mode = #tpu.pipeline_mode<synchronous>, transform_indices = @transform_2, window_bounds = array<i64: 1, 512>}, {pipeline_mode = #tpu.pipeline_mode<synchronous>, transform_indices = @transform_3, window_bounds = array<i64: 512, 256>}, {pipeline_mode = #tpu.pipeline_mode<synchronous>, transform_indices = @transform_4, window_bounds = array<i64: 1, 256>}, {pipeline_mode = #tpu.pipeline_mode<synchronous>, transform_indices = @transform_5, window_bounds = array<i64: 8, 256>}, {transform_indices = @transform_6, window_bounds = array<i64: 1>}, {transform_indices = @transform_7, window_bounds = array<i64: 1, 1, 16>}]} {
    %c0 = arith.constant 0 : index
    %c0_0 = arith.constant 0 : index
    %0 = vector.load %arg1[%c0, %c0_0] : memref<16x784xf32, #tpu.memory_space<vmem>>, vector<16x784xf32>
    %1 = arith.truncf %0 : vector<16x784xf32> to vector<16x784xbf16>
    %c0_1 = arith.constant 0 : index
    %c0_2 = arith.constant 0 : index
    %2 = vector.load %arg2[%c0_1, %c0_2] : memref<784x512xbf16, #tpu.memory_space<vmem>>, vector<784x512xbf16>
    %cst = arith.constant dense<0.000000e+00> : vector<16x512xf32>
    %3 = tpu.matmul %1, %2, %cst {dimension_numbers = #tpu.dot_dimension_numbers<[1], [0], [0], [1], [0, 0, 1, 1], [], []>} : vector<16x784xbf16>, vector<784x512xbf16>, vector<16x512xf32> -> vector<16x512xf32>
    %c0_3 = arith.constant 0 : index
    %c0_4 = arith.constant 0 : index
    %4 = vector.load %arg3[%c0_3, %c0_4] : memref<1x512xf32, #tpu.memory_space<vmem>>, vector<1x512xf32>
    %5 = vector.broadcast %4 : vector<1x512xf32> to vector<16x512xf32>
    %6 = arith.addf %3, %5 : vector<16x512xf32>
    %cst_5 = arith.constant 0.000000e+00 : f32
    %7 = vector.broadcast %cst_5 : f32 to vector<16x512xf32>
    %8 = arith.cmpf ogt, %6, %7 : vector<16x512xf32>
    %cst_6 = arith.constant 2.000000e-01 : f32
    %9 = vector.broadcast %cst_6 : f32 to vector<16x512xf32>
    %10 = arith.mulf %9, %6 : vector<16x512xf32>
    %11 = arith.select %8, %6, %10 : vector<16x512xi1>, vector<16x512xf32>
    %12 = arith.truncf %11 : vector<16x512xf32> to vector<16x512xbf16>
    %c0_7 = arith.constant 0 : index
    %c0_8 = arith.constant 0 : index
    %13 = vector.load %arg4[%c0_7, %c0_8] : memref<512x256xbf16, #tpu.memory_space<vmem>>, vector<512x256xbf16>
    %cst_9 = arith.constant dense<0.000000e+00> : vector<16x256xf32>
    %14 = tpu.matmul %12, %13, %cst_9 {dimension_numbers = #tpu.dot_dimension_numbers<[1], [0], [0], [1], [0, 0, 1, 1], [], []>} : vector<16x512xbf16>, vector<512x256xbf16>, vector<16x256xf32> -> vector<16x256xf32>
    %c0_10 = arith.constant 0 : index
    %c0_11 = arith.constant 0 : index
    %15 = vector.load %arg5[%c0_10, %c0_11] : memref<1x256xf32, #tpu.memory_space<vmem>>, vector<1x256xf32>
    %16 = vector.broadcast %15 : vector<1x256xf32> to vector<16x256xf32>
    %17 = arith.addf %14, %16 : vector<16x256xf32>
    %cst_12 = arith.constant 0.000000e+00 : f32
    %18 = vector.broadcast %cst_12 : f32 to vector<16x256xf32>
    %19 = arith.cmpf ogt, %17, %18 : vector<16x256xf32>
    %cst_13 = arith.constant 2.000000e-01 : f32
    %20 = vector.broadcast %cst_13 : f32 to vector<16x256xf32>
    %21 = arith.mulf %20, %17 : vector<16x256xf32>
    %22 = arith.select %19, %17, %21 : vector<16x256xi1>, vector<16x256xf32>
    %c0_14 = arith.constant 0 : index
    %c0_15 = arith.constant 0 : index
    %23 = vector.load %arg6[%c0_14, %c0_15] : memref<8x256xbf16, #tpu.memory_space<vmem>>, vector<8x256xbf16>
    %24 = arith.truncf %22 : vector<16x256xf32> to vector<16x256xbf16>
    %cst_16 = arith.constant dense<0.000000e+00> : vector<8x16xf32>
    %25 = tpu.matmul %23, %24, %cst_16 {dimension_numbers = #tpu.dot_dimension_numbers<[1], [1], [0], [0], [0, 0, 1, 0], [], []>} : vector<8x256xbf16>, vector<16x256xbf16>, vector<8x16xf32> -> vector<8x16xf32>
    %26 = vector.extract_strided_slice %25 {offsets = [0, 0], sizes = [1, 16], strides = [1, 1]} : vector<8x16xf32> to vector<1x16xf32>
    %c0_17 = arith.constant 0 : index
    %27 = memref.load %arg7[%c0_17] : memref<1xf32, #tpu.memory_space<smem>>
    %28 = vector.broadcast %27 : f32 to vector<1x16xf32>
    %29 = arith.addf %26, %28 : vector<1x16xf32>
    %30 = arith.negf %29 : vector<1x16xf32>
    %31 = math.exp %30 : vector<1x16xf32>
    %cst_18 = arith.constant 1.000000e+00 : f32
    %32 = vector.broadcast %cst_18 : f32 to vector<1x16xf32>
    %33 = arith.addf %32, %31 : vector<1x16xf32>
    %34 = arith.divf %32, %33 : vector<1x16xf32>
    %c0_19 = arith.constant 0 : index
    %c0_20 = arith.constant 0 : index
    %c0_21 = arith.constant 0 : index
    %35 = vector.load %arg8[%c0_19, %c0_20, %c0_21] : memref<1x1x16xf32, #tpu.memory_space<vmem>>, vector<1x1x16xf32>
    %36 = vector.shape_cast %35 : vector<1x1x16xf32> to vector<1x16xf32>
    %37 = vector.shape_cast %34 : vector<1x16xf32> to vector<1x1x16xf32>
    tpu.vector_store %arg8[%c0_19, %c0_20, %c0_21], %37 {strides = array<i32>} : memref<1x1x16xf32, #tpu.memory_space<vmem>>, vector<1x1x16xf32>,
    return
  }
  func.func @transform_0(%arg0: i32) -> (i32, i32) {
    %c0_i32 = arith.constant 0 : i32
    %c0_i32_0 = arith.constant 0 : i32
    return %arg0, %c0_i32 : i32, i32
  }
  func.func @transform_1(%arg0: i32) -> (i32, i32) {
    %c0_i32 = arith.constant 0 : i32
    %c0_i32_0 = arith.constant 0 : i32
    %c0_i32_1 = arith.constant 0 : i32
    return %c0_i32, %c0_i32_0 : i32, i32
  }
  func.func @transform_2(%arg0: i32) -> (i32, i32) {
    %c0_i32 = arith.constant 0 : i32
    %c0_i32_0 = arith.constant 0 : i32
    %c0_i32_1 = arith.constant 0 : i32
    return %c0_i32, %c0_i32_0 : i32, i32
  }
  func.func @transform_3(%arg0: i32) -> (i32, i32) {
    %c0_i32 = arith.constant 0 : i32
    %c0_i32_0 = arith.constant 0 : i32
    %c0_i32_1 = arith.constant 0 : i32
    return %c0_i32, %c0_i32_0 : i32, i32
  }
  func.func @transform_4(%arg0: i32) -> (i32, i32) {
    %c0_i32 = arith.constant 0 : i32
    %c0_i32_0 = arith.constant 0 : i32
    %c0_i32_1 = arith.constant 0 : i32
    return %c0_i32, %c0_i32_0 : i32, i32
  }
  func.func @transform_5(%arg0: i32) -> (i32, i32) {
    %c0_i32 = arith.constant 0 : i32
    %c0_i32_0 = arith.constant 0 : i32
    %c0_i32_1 = arith.constant 0 : i32
    return %c0_i32, %c0_i32_0 : i32, i32
  }
  func.func @transform_6(%arg0: i32) -> i32 {
    %c0_i32 = arith.constant 0 : i32
    %c0_i32_0 = arith.constant 0 : i32
    return %c0_i32 : i32
  }
  func.func @transform_7(%arg0: i32) -> (i32, i32, i32) {
    %c0_i32 = arith.constant 0 : i32
    %c0_i32_0 = arith.constant 0 : i32
    %c0_i32_1 = arith.constant 0 : i32
    return %arg0, %c0_i32, %c0_i32_0 : i32, i32, i32
  }
}

</mosaic_0001>

<bundles_post_ra>
// kernel: discriminator_forward.1
= control target key start
LH: loop header
LB: loop body
LE: loop exit
PB: predicated region body
PF: predicated region fallthrough
CT: control target
= control target key end

     0   :  { %13 = vsyncpa [#allocation4], 0  ;;  %s3960_s0 = inlined_call_operand.hbm [shape: f32[4,784], index: 0, kind: input, shape index: {}]   ;;  %s3961_s1 = inlined_call_operand.hbm [shape: bf16[784,512], index: 1, kind: input, shape index: {}]   ;;  %s3962_s2 = inlined_call_operand.hbm [shape: f32[1,512], index: 2, kind: input, shape index: {}]   ;;  %s3963_s3 = inlined_call_operand.hbm [shape: bf16[512,256], index: 3, kind: input, shape index: {}]   ;;  %s3964_s4 = inlined_call_operand.vmem [shape: f32[1,256], index: 4, kind: input, shape index: {}]   ;;  %s3965_s5 = inlined_call_operand.hbm [shape: bf16[8,256], index: 5, kind: input, shape index: {}]   ;;  %s3966_s6 = inlined_call_operand.<no memory space> [shape: f32[1], index: 6, kind: input, shape index: {}]   ;;  %s3967_s7 = inlined_call_operand.vmem [shape: f32[1,1,16], index: 7, kind: output, shape index: {}]  }
   0x1   :  { %14 = vsyncpa [#allocation6], 0 }
   0x2   :  { %15 = vsyncpa [#allocation9], 0  ;;  %s33_s26 = sshll.u32 %s3961_s1, 4  ;;  %s34_s26 = int_to_ptr.hbm [resolvable:$true] %s33_s26 }
   0x3   :  { %19 = vsyncadd [#allocation4], 1344  ;;  %s3829_s27 = smov [#allocation5]   ;;  %s57_s8 = sshll.u32 %s3963_s3, 4  ;;  %s58_s8 = int_to_ptr.hbm [resolvable:$true] %s57_s8 }
   0x4   :  { %s35_s28 = sshll.u32 %s3829_s27, 4  ;;  %s3830_s9 = smov 256   ;;  %s36_s28 = int_to_ptr.vmem [resolvable:$true] %s35_s28 }
   0x5   :  { %s3831_s10 = smov 16   ;;  %s3832_s11 = smov [#allocation8]  }
   0x6   :  { %41 = dma.hbm_to_vmem [thread:$0]  %s34_s26, 25088, %s36_s28, [#allocation6], %s3830_s9, %s3830_s9, %s3831_s10  }
   0x7   :  { %s59_s12 = sshll.u32 %s3832_s11, 4  ;;  %s3833_s13 = smov 128   ;;  %s60_s12 = int_to_ptr.vmem [resolvable:$true] %s59_s12 }
   0x8   :  { %s3834_s14 = smov 8   ;;  %s20_s16 = sshll.u32 %s3960_s0, 4  ;;  %s21_s16 = int_to_ptr.hbm [resolvable:$true] %s20_s16 }
   0x9   :  { %65 = dma.hbm_to_vmem [thread:$0]  %s58_s8, 8192, %s60_s12, [#allocation9], %s3833_s13, %s3833_s13, %s3834_s14  }
   0xa   :  { %s3835_s17 = smov [#allocation3]   ;;  %s47_s20 = sshll.u32 %s3962_s2, 4  ;;  %s48_s20 = int_to_ptr.hbm [resolvable:$true] %s47_s20 }
   0xb   :  { %s22_s18 = sshll.u32 %s3835_s17, 4  ;;  %s3836_s21 = smov 448   ;;  %s23_s18 = int_to_ptr.vmem [resolvable:$true] %s22_s18 }
   0xc   :  { %s3837_s22 = smov 28   ;;  %s3838_s23 = smov [#allocation7]  }
   0xd   :  { %28 = dma.hbm_to_vmem [thread:$0]  %s21_s16, 448, %s23_s18, [#allocation4], %s3836_s21, %s3836_s21, %s3837_s22  }
   0xe   :  { %s49_s24 = sshll.u32 %s3838_s23, 4  ;;  %s73_s27 = sshll.u32 %s3965_s5, 4  ;;  %s50_s24 = int_to_ptr.vmem [resolvable:$true] %s49_s24  ;;  %s74_s27 = int_to_ptr.hbm [resolvable:$true] %s73_s27 }
   0xf   :  { %52 = dma.hbm_to_vmem [thread:$0]  %s48_s20, 64, %s50_s24, [#allocation6]  }
  0x10   :  { %s3839_s0 = smov [#allocation10]  }
  0x11   :  { %s75_s28 = sshll.u32 %s3839_s0, 4  ;;  %s76_s28 = int_to_ptr.vmem [resolvable:$true] %s75_s28 }
  0x12   :  { %78 = dma.hbm_to_vmem [thread:$0]  %s74_s27, 128, %s76_s28, [#allocation9]  }
  0x13   :  { %3823 = dma.done.wait [#allocation4], 1792  }
  0x14   :  { %3824 = vsyncadd [#allocation4], 4294965504 }
  0x15   :  { %3825 = dma.done.wait [#allocation6], 25152  }
  0x16   :  { %3826 = vsyncadd [#allocation6], 4294942144 }
  0x17   :  { %3827 = dma.done.wait [#allocation9], 8320  }
  0x18   :  { %3828 = vsyncadd [#allocation9], 4294958976  ;;  %v2497_v0 = vld [vmem:[#allocation5 + $0xe0] sm:$0xf]  ;;  %v3458_v1 = vld [vmem:[#allocation5 + $0xec] sm:$0xf0] }
  0x19   :  { %v2625_v2 = vld [vmem:[#allocation5 + $0x1e0] sm:$0xf]  ;;  %v2498_v3 = vor.u32 %v3458_v1, %v2497_v0  ;;  %v3490_v4 = vld [vmem:[#allocation5 + $0x1ec] sm:$0xf0]  ;;  %vm1378_vm0 = vcmask 130048  }
  0x1a   :  { %v2753_v5 = vld [vmem:[#allocation5 + $0x2e0] sm:$0xf]  ;;  %v3522_v6 = vld [vmem:[#allocation5 + $0x2ec] sm:$0xf0]  ;;  %v2626_v7 = vor.u32 %v3490_v4, %v2625_v2 }
  0x1b   :  { %v2754_v8 = vor.u32 %v3522_v6, %v2753_v5  ;;  %v2881_v9 = vld [vmem:[#allocation5 + $0x3e0] sm:$0xf]  ;;  %v3554_v10 = vld [vmem:[#allocation5 + $0x3ec] sm:$0xf0]  ;;  %1382 = vmatpush.bf16.msra.mxu0 %v2498_v3 }
  0x1c   :  { %v2481_v11 = vld [vmem:[#allocation5 + $0xc0] sm:$0xf]  ;;  %v2882_v12 = vor.u32 %v3554_v10, %v2881_v9  ;;  %v3454_v13 = vld [vmem:[#allocation5 + $0xcc] sm:$0xf0]  ;;  %1396 = vmatpush.bf16.msra.mxu1 %v2626_v7 }
  0x1d   :  { %v2609_v14 = vld [vmem:[#allocation5 + $0x1c0] sm:$0xf]  ;;  %v3486_v15 = vld [vmem:[#allocation5 + $0x1cc] sm:$0xf0]  ;;  %1410 = vmatpush.bf16.msra.mxu2 %v2754_v8  ;;  %v2482_v16 = vor.u32 %v3454_v13, %v2481_v11 }
  0x1e   :  { %v2610_v17 = vor.u32 %v3486_v15, %v2609_v14  ;;  %v2737_v18 = vld [vmem:[#allocation5 + $0x2c0] sm:$0xf]  ;;  %v3518_v19 = vld [vmem:[#allocation5 + $0x2cc] sm:$0xf0]  ;;  %1424 = vmatpush.bf16.msra.mxu3 %v2882_v12 }
  0x1f   :  { %v2865_v20 = vld [vmem:[#allocation5 + $0x3c0] sm:$0xf]  ;;  %v2738_v21 = vor.u32 %v3518_v19, %v2737_v18  ;;  %v3550_v22 = vld [vmem:[#allocation5 + $0x3cc] sm:$0xf0]  ;;  %1383 = vmatpush.bf16.msra.mxu0 %v2482_v16 }
  0x20   :  { %v2465_v23 = vld [vmem:[#allocation5 + $0xa0] sm:$0xf]  ;;  %v3450_v24 = vld [vmem:[#allocation5 + $0xac] sm:$0xf0]  ;;  %v2866_v25 = vor.u32 %v3550_v22, %v2865_v20  ;;  %1397 = vmatpush.bf16.msra.mxu1 %v2610_v17 }
  0x21   :  { %v2593_v26 = vld [vmem:[#allocation5 + $0x1a0] sm:$0xf]  ;;  %v3482_v27 = vld [vmem:[#allocation5 + $0x1ac] sm:$0xf0]  ;;  %v2466_v29 = vor.u32 %v3450_v24, %v2465_v23  ;;  %1411 = vmatpush.bf16.msra.mxu2 %v2738_v21  ;;  %v103_v23 = vld [vmem:[#allocation3 + $0x8] sm:$0xff] }
  0x22   :  { %v2721_v28 = vld [vmem:[#allocation5 + $0x2a0] sm:$0xf]  ;;  %v3514_v30 = vld [vmem:[#allocation5 + $0x2ac] sm:$0xf0]  ;;  %v2594_v33 = vor.u32 %v3482_v27, %v2593_v26  ;;  %1425 = vmatpush.bf16.msra.mxu3 %v2866_v25  ;;  %v107_v24 = vld [vmem:[#allocation3 + $0x24] sm:$0xff] }
  0x23   :  { %v2849_v31 = vld [vmem:[#allocation5 + $0x3a0] sm:$0xf]  ;;  %v3546_v32 = vld [vmem:[#allocation5 + $0x3ac] sm:$0xf0]  ;;  %v2722_v34 = vor.u32 %v3514_v30, %v2721_v28  ;;  %1384 = vmatpush.bf16.msra.mxu0 %v2466_v29  ;;  %138 = vst [vmem:[#allocation1 + $0x10] ss:$2 sm:$0xff] %v103_v23 }
  0x24   :  { %v2449_v35 = vld [vmem:[#allocation5 + $0x80] sm:$0xf]  ;;  %v3446_v36 = vld [vmem:[#allocation5 + $0x8c] sm:$0xf0]  ;;  %v2850_v38 = vor.u32 %v3546_v32, %v2849_v31  ;;  %1398 = vmatpush.bf16.msra.mxu1 %v2594_v33  ;;  %140 = vst [vmem:[#allocation1 + $0x11] ss:$2 sm:$0xff] %v107_v24 }
  0x25   :  { %v2577_v37 = vld [vmem:[#allocation5 + $0x180] sm:$0xf]  ;;  %v3478_v39 = vld [vmem:[#allocation5 + $0x18c] sm:$0xf0]  ;;  %v2450_v44 = vor.u32 %v3446_v36, %v2449_v35  ;;  %1412 = vmatpush.bf16.msra.mxu2 %v2722_v34 }
  0x26   :  { %v2705_v40 = vld [vmem:[#allocation5 + $0x280] sm:$0xf]  ;;  %v3510_v41 = vld [vmem:[#allocation5 + $0x28c] sm:$0xf0]  ;;  %v2578_v45 = vor.u32 %v3478_v39, %v2577_v37  ;;  %1426 = vmatpush.bf16.msra.mxu3 %v2850_v38  ;;  %v3456_v37 = vld [vmem:[#allocation5 + $0xe4] sm:$0xf] }
  0x27   :  { %v2833_v42 = vld [vmem:[#allocation5 + $0x380] sm:$0xf]  ;;  %v3542_v43 = vld [vmem:[#allocation5 + $0x38c] sm:$0xf0]  ;;  %v2706_v46 = vor.u32 %v3510_v41, %v2705_v40  ;;  %1385 = vmatpush.bf16.msra.mxu0 %v2450_v44  ;;  %v2499_v38 = vld [vmem:[#allocation5 + $0xf0] sm:$0xf0] }
  0x28   :  { %v2433_v47 = vld [vmem:[#allocation5 + $0x60] sm:$0xf]  ;;  %v3442_v48 = vld [vmem:[#allocation5 + $0x6c] sm:$0xf0]  ;;  %v2834_v50 = vor.u32 %v3542_v43, %v2833_v42  ;;  %1399 = vmatpush.bf16.msra.mxu1 %v2578_v45 }
  0x29   :  { %v2561_v49 = vld [vmem:[#allocation5 + $0x160] sm:$0xf]  ;;  %v3474_v51 = vld [vmem:[#allocation5 + $0x16c] sm:$0xf0]  ;;  %v2434_v56 = vor.u32 %v3442_v48, %v2433_v47  ;;  %1413 = vmatpush.bf16.msra.mxu2 %v2706_v46  ;;  %v2502_v48 = vor.u32 %v3456_v37, %v2499_v38 }
  0x2a   :  { %v2689_v52 = vld [vmem:[#allocation5 + $0x260] sm:$0xf]  ;;  %v3506_v53 = vld [vmem:[#allocation5 + $0x26c] sm:$0xf0]  ;;  %v2562_v57 = vor.u32 %v3474_v51, %v2561_v49  ;;  %1427 = vmatpush.bf16.msra.mxu3 %v2834_v50 }
  0x2b   :  { %v2817_v54 = vld [vmem:[#allocation5 + $0x360] sm:$0xf]  ;;  %v3538_v55 = vld [vmem:[#allocation5 + $0x36c] sm:$0xf0]  ;;  %v2690_v58 = vor.u32 %v3506_v53, %v2689_v52  ;;  %1386 = vmatpush.bf16.msra.mxu0 %v2434_v56  ;;  %v110_v53 = vld [vmem:[#allocation3 + $0x38] sm:$0xff] }
  0x2c   :  { %v2417_v59 = vld [vmem:[#allocation5 + $0x40] sm:$0xf]  ;;  %v3438_v60 = vld [vmem:[#allocation5 + $0x4c] sm:$0xf0]  ;;  %v2818_v62 = vor.u32 %v3538_v55, %v2817_v54  ;;  %1400 = vmatpush.bf16.msra.mxu1 %v2562_v57  ;;  %v3452_v55 = vld [vmem:[#allocation5 + $0xc4] sm:$0xf] }
  0x2d   :  { %v2545_v61 = vld [vmem:[#allocation5 + $0x140] sm:$0xf]  ;;  %v3470_v63 = vld [vmem:[#allocation5 + $0x14c] sm:$0xf0]  ;;  %v2418_v4 = vor.u32 %v3438_v60, %v2417_v59  ;;  %1414 = vmatpush.bf16.msra.mxu2 %v2690_v58  ;;  %v2483_v56 = vld [vmem:[#allocation5 + $0xd0] sm:$0xf0] }
  0x2e   :  { %v2673_v0 = vld [vmem:[#allocation5 + $0x240] sm:$0xf]  ;;  %v3502_v1 = vld [vmem:[#allocation5 + $0x24c] sm:$0xf0]  ;;  %v2546_v6 = vor.u32 %v3470_v63, %v2545_v61  ;;  %1428 = vmatpush.bf16.msra.mxu3 %v2818_v62  ;;  %v114_v59 = vld [vmem:[#allocation3 + $0x54] sm:$0xff] }
  0x2f   :  { %v2801_v2 = vld [vmem:[#allocation5 + $0x340] sm:$0xf]  ;;  %v3534_v3 = vld [vmem:[#allocation5 + $0x34c] sm:$0xf0]  ;;  %v2674_v7 = vor.u32 %v3502_v1, %v2673_v0  ;;  %1387 = vmatpush.bf16.msra.mxu0 %v2418_v4  ;;  %v2467_v4 = vld [vmem:[#allocation5 + $0xb0] sm:$0xf0] }
  0x30   :  { %v2401_v5 = vld [vmem:[#allocation5 + $0x20] sm:$0xf]  ;;  %v3434_v8 = vld [vmem:[#allocation5 + $0x2c] sm:$0xf0]  ;;  %v2802_v11 = vor.u32 %v3534_v3, %v2801_v2  ;;  %1401 = vmatpush.bf16.msra.mxu1 %v2546_v6  ;;  %v2486_v2 = vor.u32 %v3452_v55, %v2483_v56  ;;  %v3448_v3 = vld [vmem:[#allocation5 + $0xa4] sm:$0xf] }
  0x31   :  { %v2529_v9 = vld [vmem:[#allocation5 + $0x120] sm:$0xf]  ;;  %v3466_v10 = vld [vmem:[#allocation5 + $0x12c] sm:$0xf0]  ;;  %v2402_v18 = vor.u32 %v3434_v8, %v2401_v5  ;;  %1415 = vmatpush.bf16.msra.mxu2 %v2674_v7  ;;  %v3488_v7 = vld [vmem:[#allocation5 + $0x1e4] sm:$0xf] }
  0x32   :  { %v2657_v12 = vld [vmem:[#allocation5 + $0x220] sm:$0xf]  ;;  %v3498_v13 = vld [vmem:[#allocation5 + $0x22c] sm:$0xf0]  ;;  %v2530_v25 = vor.u32 %v3466_v10, %v2529_v9  ;;  %1429 = vmatpush.bf16.msra.mxu3 %v2802_v11  ;;  %v2627_v8 = vld [vmem:[#allocation5 + $0x1f0] sm:$0xf0] }
  0x33   :  { %v2785_v14 = vld [vmem:[#allocation5 + $0x320] sm:$0xf]  ;;  %v3530_v15 = vld [vmem:[#allocation5 + $0x32c] sm:$0xf0]  ;;  %v2658_v26 = vor.u32 %v3498_v13, %v2657_v12  ;;  %1388 = vmatpush.bf16.msra.mxu0 %v2402_v18  ;;  %v2470_v12 = vor.u32 %v3448_v3, %v2467_v4  ;;  %v3484_v18 = vld [vmem:[#allocation5 + $0x1c4] sm:$0xf] }
  0x34   :  { %v2385_v16 = vld [vmem:[#allocation5] sm:$0xf]  ;;  %v3430_v17 = vld [vmem:[#allocation5 + $0xc] sm:$0xf0]  ;;  %v2786_v30 = vor.u32 %v3530_v15, %v2785_v14  ;;  %1402 = vmatpush.bf16.msra.mxu1 %v2530_v25 }
  0x35   :  { %v2513_v19 = vld [vmem:[#allocation5 + $0x100] sm:$0xf]  ;;  %v3462_v20 = vld [vmem:[#allocation5 + $0x10c] sm:$0xf0]  ;;  %v2386_v36 = vor.u32 %v3430_v17, %v2385_v16  ;;  %1416 = vmatpush.bf16.msra.mxu2 %v2658_v26  ;;  %v3444_v16 = vld [vmem:[#allocation5 + $0x84] sm:$0xf] }
  0x36   :  { %v2641_v21 = vld [vmem:[#allocation5 + $0x200] sm:$0xf]  ;;  %v3494_v22 = vld [vmem:[#allocation5 + $0x20c] sm:$0xf0]  ;;  %v2514_v39 = vor.u32 %v3462_v20, %v2513_v19  ;;  %1430 = vmatpush.bf16.msra.mxu3 %v2786_v30  ;;  %v2451_v17 = vld [vmem:[#allocation5 + $0x90] sm:$0xf0] }
  0x37   :  { %v2769_v27 = vld [vmem:[#allocation5 + $0x300] sm:$0xf]  ;;  %v3526_v28 = vld [vmem:[#allocation5 + $0x30c] sm:$0xf0]  ;;  %v2642_v40 = vor.u32 %v3494_v22, %v2641_v21  ;;  %1389 = vmatpush.bf16.msra.mxu0 %v2386_v36  ;;  %v2611_v19 = vld [vmem:[#allocation5 + $0x1d0] sm:$0xf0]  ;;  %v2630_v21 = vor.u32 %v3488_v7, %v2627_v8 }
  0x38   :  { %v3009_v29 = vld [vmem:[#allocation5 + $0x4e0] sm:$0xf]  ;;  %v3586_v31 = vld [vmem:[#allocation5 + $0x4ec] sm:$0xf0]  ;;  %v2770_v43 = vor.u32 %v3526_v28, %v2769_v27  ;;  %1403 = vmatpush.bf16.msra.mxu1 %v2514_v39  ;;  %v2454_v27 = vor.u32 %v3444_v16, %v2451_v17  ;;  %v2614_v36 = vor.u32 %v3484_v18, %v2611_v19  ;;  %v3480_v39 = vld [vmem:[#allocation5 + $0x1a4] sm:$0xf] }
  0x39   :  { %v3137_v32 = vld [vmem:[#allocation5 + $0x5e0] sm:$0xf]  ;;  %v3618_v33 = vld [vmem:[#allocation5 + $0x5ec] sm:$0xf0]  ;;  %v3010_v44 = vor.u32 %v3586_v31, %v3009_v29  ;;  %1417 = vmatpush.bf16.msra.mxu2 %v2642_v40  ;;  %v2595_v40 = vld [vmem:[#allocation5 + $0x1b0] sm:$0xf0] }
  0x3a   :  { %v102_v34 = vld [vmem:[#allocation3] sm:$0xff]  ;;  %v3153_v41 = vld [vmem:[#allocation5 + $0x600] sm:$0xf]  ;;  %v3138_v47 = vor.u32 %v3618_v33, %v3137_v32  ;;  %v151_v57 = vld.sshfl [vmem:[#allocation1 + $0x10] sm:$0xff pattern:$0x75316420]  ;;  %1431 = vmatpush.bf16.msra.mxu3 %v2770_v43 }
  0x3b   :  { %v106_v35 = vld [vmem:[#allocation3 + $0x1c] sm:$0xff]  ;;  %134 = vst [vmem:[#allocation1] ss:$2 sm:$0xff] %v102_v34  ;;  %v2993_v49 = vld [vmem:[#allocation5 + $0x4c0] sm:$0xf]  ;;  %1438 = vmatpush.bf16.msrb.mxu0 %v3010_v44 }
  0x3c   :  { %v3622_v42 = vld [vmem:[#allocation5 + $0x60c] sm:$0xf0]  ;;  %136 = vst [vmem:[#allocation1 + $0x1] ss:$2 sm:$0xff] %v106_v35  ;;  %v3121_v51 = vld [vmem:[#allocation5 + $0x5c0] sm:$0xf]  ;;  %1452 = vmatpush.bf16.msrb.mxu1 %v3138_v47 }
  0x3d   :  { %v111_v45 = vld [vmem:[#allocation3 + $0x40] sm:$0xff]  ;;  %v3154_v52 = vor.u32 %v3622_v42, %v3153_v41  ;;  %v152_v58 = vld.sshfl [vmem:[#allocation1 + $0x18] sm:$0xff pattern:$0x75316420] }
  0x3e   :  { %v115_v46 = vld [vmem:[#allocation3 + $0x5c] sm:$0xff]  ;;  %v2977_v60 = vld [vmem:[#allocation5 + $0x4a0] sm:$0xf]  ;;  %158 = vst [vmem:[#allocation1 + $0x10] ss:$2 sm:$0xff] %v111_v45  ;;  %1480 = vmatpush.bf16.msrb.mxu3 %v2502_v48 }
  0x3f   :  { %v3582_v50 = vld [vmem:[#allocation5 + $0x4cc] sm:$0xf0]  ;;  %v3105_v63 = vld [vmem:[#allocation5 + $0x5a0] sm:$0xf]  ;;  %159 = vst [vmem:[#allocation1 + $0x11] ss:$2 sm:$0xff] %v115_v46  ;;  %1473 = vmatpush.bf16.msrb.mxu2 %v3154_v52 }
  0x40   :  { %v3614_v54 = vld [vmem:[#allocation5 + $0x5cc] sm:$0xf0]  ;;  %v2994_v62 = vor.u32 %v3582_v50, %v2993_v49  ;;  %v2961_v10 = vld [vmem:[#allocation5 + $0x480] sm:$0xf]  ;;  %v3440_v32 = vld [vmem:[#allocation5 + $0x64] sm:$0xf] }
  0x41   :  { %v3578_v61 = vld [vmem:[#allocation5 + $0x4ac] sm:$0xf0]  ;;  %v3122_v1 = vor.u32 %v3614_v54, %v3121_v51  ;;  %v3089_v14 = vld [vmem:[#allocation5 + $0x580] sm:$0xf]  ;;  %v2435_v33 = vld [vmem:[#allocation5 + $0x70] sm:$0xf0] }
  0x42   :  { %v3610_v0 = vld [vmem:[#allocation5 + $0x5ac] sm:$0xf0]  ;;  %1439 = vmatpush.bf16.msrb.mxu0 %v2994_v62  ;;  %v2978_v9 = vor.u32 %v3578_v61, %v2977_v60  ;;  %1481 = vmatpush.bf16.msrb.mxu3 %v2486_v2  ;;  %v2945_v28 = vld [vmem:[#allocation5 + $0x460] sm:$0xf]  ;;  %v2438_v43 = vor.u32 %v3440_v32, %v2435_v33  ;;  %v3436_v48 = vld [vmem:[#allocation5 + $0x44] sm:$0xf] }
  0x43   :  { %v149_v5 = vld.sshfl [vmem:[#allocation1] sm:$0xff pattern:$0x75316420]  ;;  %v150_v6 = vld.sshfl [vmem:[#allocation1 + $0x8] sm:$0xff pattern:$0x75316420]  ;;  %1453 = vmatpush.bf16.msrb.mxu1 %v3122_v1  ;;  %v3106_v11 = vor.u32 %v3610_v0, %v3105_v63 }
  0x44   :  { %156 = vst [vmem:[#allocation1] ss:$2 sm:$0xff] %v110_v53  ;;  %v3574_v13 = vld [vmem:[#allocation5 + $0x48c] sm:$0xf0]  ;;  %v3073_v30 = vld [vmem:[#allocation5 + $0x560] sm:$0xf]  ;;  %v2598_v53 = vor.u32 %v3480_v39, %v2595_v40 }
  0x45   :  { %157 = vst [vmem:[#allocation1 + $0x1] ss:$2 sm:$0xff] %v114_v59  ;;  %v3606_v15 = vld [vmem:[#allocation5 + $0x58c] sm:$0xf0]  ;;  %v2962_v23 = vor.u32 %v3574_v13, %v2961_v10  ;;  %v2929_v44 = vld [vmem:[#allocation5 + $0x440] sm:$0xf] }
  0x46   :  { %v166_v20 = vld.sshfl [vmem:[#allocation1 + $0x10] sm:$0xff pattern:$0x75316420]  ;;  %v167_v22 = vld.sshfl [vmem:[#allocation1 + $0x18] sm:$0xff pattern:$0x75316420]  ;;  %1440 = vmatpush.bf16.msrb.mxu0 %v2978_v9  ;;  %v3090_v24 = vor.u32 %v3606_v15, %v3089_v14  ;;  %1482 = vmatpush.bf16.msrb.mxu3 %v2470_v12 }
  0x47   :  { %v3895_v25 = vpack.c.bf16 %v166_v20, %v151_v57  ;;  %v3897_v26 = vpack.c.bf16 %v167_v22, %v152_v58  ;;  %1454 = vmatpush.bf16.msrb.mxu1 %v3106_v11  ;;  %v3570_v29 = vld [vmem:[#allocation5 + $0x46c] sm:$0xf0]  ;;  %v3057_v46 = vld [vmem:[#allocation5 + $0x540] sm:$0xf]  ;;  %v2419_v49 = vld [vmem:[#allocation5 + $0x50] sm:$0xf0] }
  0x48   :  { %v3602_v31 = vld [vmem:[#allocation5 + $0x56c] sm:$0xf0]  ;;  %v2946_v41 = vor.u32 %v3570_v29, %v2945_v28  ;;  %v3476_v50 = vld [vmem:[#allocation5 + $0x184] sm:$0xf]  ;;  %v2579_v51 = vld [vmem:[#allocation5 + $0x190] sm:$0xf0]  ;;  %v2422_v59 = vor.u32 %v3436_v48, %v2419_v49 }
  0x49   :  { %1418 = vmatmul.bf16.vlgmr.msra.gmra.mxu2 %v3895_v25  ;;  %1432 = vmatmul.bf16.vlgmr.msra.gmra.mxu3 %v3897_v26  ;;  %v3074_v42 = vor.u32 %v3602_v31, %v3073_v30  ;;  %v3566_v45 = vld [vmem:[#allocation5 + $0x44c] sm:$0xf0]  ;;  %v105_v52 = vld [vmem:[#allocation3 + $0x18] sm:$0xf]  ;;  %v2913_v55 = vld [vmem:[#allocation5 + $0x420] sm:$0xf]  ;;  %v2582_v3 = vor.u32 %v3476_v50, %v2579_v51 }
  0x4a   :  { %1494 = vmatpush.bf16.msra.mxu2 %v2630_v21  ;;  %1441 = vmatpush.bf16.msrb.mxu0 %v2962_v23  ;;  %v3598_v47 = vld [vmem:[#allocation5 + $0x54c] sm:$0xf0]  ;;  %v2930_v54 = vor.u32 %v3566_v45, %v2929_v44  ;;  %v109_v57 = vld [vmem:[#allocation3 + $0x34] sm:$0xf]  ;;  %v3041_v60 = vld [vmem:[#allocation5 + $0x520] sm:$0xf] }
  0x4b   :  { %1455 = vmatpush.bf16.msrb.mxu1 %v3090_v24  ;;  %1483 = vmatpush.bf16.msrb.mxu3 %v2454_v27  ;;  %v3562_v56 = vld [vmem:[#allocation5 + $0x42c] sm:$0xf0]  ;;  %v3058_v58 = vor.u32 %v3598_v47, %v3057_v46  ;;  %146 = vst [vmem:[#allocation1 + $0x30] ss:$2 sm:$0xff] %v105_v52  ;;  %v3432_v62 = vld [vmem:[#allocation5 + $0x24] sm:$0xf] }
  0x4c   :  { %v164_v34 = vld.sshfl [vmem:[#allocation1] sm:$0xff pattern:$0x75316420]  ;;  %v165_v35 = vld.sshfl [vmem:[#allocation1 + $0x8] sm:$0xff pattern:$0x75316420]  ;;  %v2914_v4 = vor.u32 %v3562_v56, %v2913_v55 }
  0x4d   :  { %v3901_v37 = vpack.c.bf16 %v164_v34, %v149_v5  ;;  %v3903_v38 = vpack.c.bf16 %v165_v35, %v150_v6  ;;  %v3594_v61 = vld [vmem:[#allocation5 + $0x52c] sm:$0xf0]  ;;  %v2403_v63 = vld [vmem:[#allocation5 + $0x30] sm:$0xf0]  ;;  %148 = vst [vmem:[#allocation1 + $0x31] ss:$2 sm:$0xff] %v109_v57 }
  0x4e   :  { %1495 = vmatpush.bf16.msra.mxu2 %v2614_v36  ;;  %1442 = vmatpush.bf16.msrb.mxu0 %v2946_v41  ;;  %v3472_v0 = vld [vmem:[#allocation5 + $0x164] sm:$0xf]  ;;  %v2563_v1 = vld [vmem:[#allocation5 + $0x170] sm:$0xf0]  ;;  %v2897_v5 = vld [vmem:[#allocation5 + $0x400] sm:$0xf]  ;;  %v3042_v8 = vor.u32 %v3594_v61, %v3041_v60  ;;  %v2406_v9 = vor.u32 %v3432_v62, %v2403_v63 }
  0x4f   :  { %1390 = vmatmul.bf16.vlgmr.msra.gmra.mxu0 %v3901_v37  ;;  %1404 = vmatmul.bf16.vlgmr.msra.gmra.mxu1 %v3903_v38  ;;  %v104_v2 = vld [vmem:[#allocation3 + $0x10] sm:$0xff]  ;;  %v3558_v6 = vld [vmem:[#allocation5 + $0x40c] sm:$0xf0]  ;;  %v2387_v13 = vld [vmem:[#allocation5 + $0x10] sm:$0xf0]  ;;  %v2566_v21 = vor.u32 %v3472_v0, %v2563_v1 }
  0x50   :  { %1456 = vmatpush.bf16.msrb.mxu1 %v3074_v42  ;;  %1484 = vmatpush.bf16.msrb.mxu3 %v2438_v43  ;;  %v3025_v7 = vld [vmem:[#allocation5 + $0x500] sm:$0xf]  ;;  %v3590_v11 = vld [vmem:[#allocation5 + $0x50c] sm:$0xf0]  ;;  %v3428_v12 = vld [vmem:[#allocation5 + $0x4] sm:$0xf]  ;;  %v2898_v22 = vor.u32 %v3558_v6, %v2897_v5 }
  0x51   :  { %v113_v10 = vld [vmem:[#allocation3 + $0x50] sm:$0xf]  ;;  %v117_v14 = vld [vmem:[#allocation3 + $0x6c] sm:$0xf]  ;;  %v3520_v15 = vld [vmem:[#allocation5 + $0x2e4] sm:$0xf]  ;;  %v3026_v29 = vor.u32 %v3590_v11, %v3025_v7  ;;  %v2390_v30 = vor.u32 %v3428_v12, %v2387_v13 }
  0x52   :  { %1496 = vmatpush.bf16.msra.mxu2 %v2598_v53  ;;  %1443 = vmatpush.bf16.msrb.mxu0 %v2930_v54  ;;  %v2755_v16 = vld [vmem:[#allocation5 + $0x2f0] sm:$0xf0]  ;;  %v108_v17 = vld [vmem:[#allocation3 + $0x2c] sm:$0xff]  ;;  %v3468_v18 = vld [vmem:[#allocation5 + $0x144] sm:$0xf] }
  0x53   :  { %v3552_v19 = vld [vmem:[#allocation5 + $0x3e4] sm:$0xf]  ;;  %v2883_v20 = vld [vmem:[#allocation5 + $0x3f0] sm:$0xf0]  ;;  %142 = vst [vmem:[#allocation1 + $0x20] ss:$2 sm:$0xff] %v104_v2  ;;  %v2758_v31 = vor.u32 %v3520_v15, %v2755_v16 }
  0x54   :  { %1457 = vmatpush.bf16.msrb.mxu1 %v3058_v58  ;;  %1485 = vmatpush.bf16.msrb.mxu3 %v2422_v59  ;;  %v3584_v23 = vld [vmem:[#allocation5 + $0x4e4] sm:$0xf]  ;;  %v3011_v24 = vld [vmem:[#allocation5 + $0x4f0] sm:$0xf0]  ;;  %144 = vst [vmem:[#allocation1 + $0x21] ss:$2 sm:$0xff] %v108_v17  ;;  %v2886_v32 = vor.u32 %v3552_v19, %v2883_v20 }
  0x55   :  { %v2547_v27 = vld [vmem:[#allocation5 + $0x150] sm:$0xf0]  ;;  %v155_v28 = vld.sshfl [vmem:[#allocation1 + $0x30] sm:$0xff pattern:$0x75316420]  ;;  %v3014_v36 = vor.u32 %v3584_v23, %v3011_v24 }
  0x56   :  { %1497 = vmatpush.bf16.msra.mxu2 %v2582_v3  ;;  %1444 = vmatpush.bf16.msrb.mxu0 %v2914_v4  ;;  %162 = vst [vmem:[#allocation1 + $0x30] ss:$2 sm:$0xff] %v113_v10  ;;  %v3516_v33 = vld [vmem:[#allocation5 + $0x2c4] sm:$0xf]  ;;  %v2739_v34 = vld [vmem:[#allocation5 + $0x2d0] sm:$0xf0]  ;;  %v2550_v41 = vor.u32 %v3468_v18, %v2547_v27 }
  0x57   :  { %163 = vst [vmem:[#allocation1 + $0x31] ss:$2 sm:$0xff] %v117_v14  ;;  %v3464_v35 = vld [vmem:[#allocation5 + $0x124] sm:$0xf]  ;;  %v2867_v40 = vld [vmem:[#allocation5 + $0x3d0] sm:$0xf0]  ;;  %v2742_v48 = vor.u32 %v3516_v33, %v2739_v34 }
  0x58   :  { %1458 = vmatpush.bf16.msrb.mxu1 %v3042_v8  ;;  %1486 = vmatpush.bf16.msrb.mxu3 %v2406_v9  ;;  %v3548_v39 = vld [vmem:[#allocation5 + $0x3c4] sm:$0xf]  ;;  %v2531_v42 = vld [vmem:[#allocation5 + $0x130] sm:$0xf0]  ;;  %v112_v45 = vld [vmem:[#allocation3 + $0x48] sm:$0xff] }
  0x59   :  { %v3580_v43 = vld [vmem:[#allocation5 + $0x4c4] sm:$0xf]  ;;  %v2995_v44 = vld [vmem:[#allocation5 + $0x4d0] sm:$0xf0]  ;;  %v2870_v49 = vor.u32 %v3548_v39, %v2867_v40  ;;  %v2534_v58 = vor.u32 %v3464_v35, %v2531_v42 }
  0x5a   :  { %1498 = vmatpush.bf16.msra.mxu2 %v2566_v21  ;;  %1445 = vmatpush.bf16.msrb.mxu0 %v2898_v22  ;;  %v116_v46 = vld [vmem:[#allocation3 + $0x64] sm:$0xff]  ;;  %v3512_v47 = vld [vmem:[#allocation5 + $0x2a4] sm:$0xf]  ;;  %v2998_v57 = vor.u32 %v3580_v43, %v2995_v44 }
  0x5b   :  { %v2723_v50 = vld [vmem:[#allocation5 + $0x2b0] sm:$0xf0]  ;;  %v3544_v51 = vld [vmem:[#allocation5 + $0x3a4] sm:$0xf] }
  0x5c   :  { %1459 = vmatpush.bf16.msrb.mxu1 %v3026_v29  ;;  %1487 = vmatpush.bf16.msrb.mxu3 %v2390_v30  ;;  %v2851_v52 = vld [vmem:[#allocation5 + $0x3b0] sm:$0xf0]  ;;  %v153_v53 = vld.sshfl [vmem:[#allocation1 + $0x20] sm:$0xff pattern:$0x75316420]  ;;  %v2726_v0 = vor.u32 %v3512_v47, %v2723_v50 }
  0x5d   :  { %v154_v54 = vld.sshfl [vmem:[#allocation1 + $0x28] sm:$0xff pattern:$0x75316420]  ;;  %v3460_v55 = vld [vmem:[#allocation5 + $0x104] sm:$0xf]  ;;  %v2854_v1 = vor.u32 %v3544_v51, %v2851_v52 }
  0x5e   :  { %1508 = vmatpush.bf16.msra.mxu0 %v2758_v31  ;;  %v2515_v56 = vld [vmem:[#allocation5 + $0x110] sm:$0xf0]  ;;  %1499 = vmatpush.bf16.msra.mxu2 %v2550_v41  ;;  %160 = vst [vmem:[#allocation1 + $0x20] ss:$2 sm:$0xff] %v112_v45  ;;  %v3576_v59 = vld [vmem:[#allocation5 + $0x4a4] sm:$0xf] }
  0x5f   :  { %v2979_v60 = vld [vmem:[#allocation5 + $0x4b0] sm:$0xf0]  ;;  %1488 = vmatmul.bf16.vlgmr.msrb.gmra.mxu3 %v3901_v37  ;;  %161 = vst [vmem:[#allocation1 + $0x21] ss:$2 sm:$0xff] %v116_v46  ;;  %v3616_v61 = vld [vmem:[#allocation5 + $0x5e4] sm:$0xf]  ;;  %v2518_v8 = vor.u32 %v3460_v55, %v2515_v56 }
  0x60   :  { %1522 = vmatpush.bf16.msra.mxu1 %v2886_v32  ;;  %1536 = vmatpush.bf16.msra.mxu3 %v3014_v36  ;;  %v3139_v62 = vld [vmem:[#allocation5 + $0x5f0] sm:$0xf0]  ;;  %v170_v63 = vld.sshfl [vmem:[#allocation1 + $0x30] sm:$0xff pattern:$0x75316420]  ;;  %v2982_v4 = vor.u32 %v3576_v59, %v2979_v60 }
  0x61   :  { %v3508_v2 = vld [vmem:[#allocation5 + $0x284] sm:$0xf]  ;;  %v3908_v3 = vpack.c.bf16 %v170_v63, %v155_v28  ;;  %v2707_v5 = vld [vmem:[#allocation5 + $0x290] sm:$0xf0]  ;;  %v3142_v9 = vor.u32 %v3616_v61, %v3139_v62 }
  0x62   :  { %1509 = vmatpush.bf16.msra.mxu0 %v2742_v48  ;;  %v3540_v6 = vld [vmem:[#allocation5 + $0x384] sm:$0xf]  ;;  %v2835_v7 = vld [vmem:[#allocation5 + $0x390] sm:$0xf0]  ;;  %1500 = vmatpush.bf16.msra.mxu2 %v2534_v58  ;;  %v2710_v14 = vor.u32 %v3508_v2, %v2707_v5 }
  0x63   :  { %3167 = vmatmul.msk.bf16.vlgmr.msrb.gmra.mxu2 %vm1378_vm0, %v3908_v3  ;;  %v3572_v10 = vld [vmem:[#allocation5 + $0x484] sm:$0xf]  ;;  %v2963_v11 = vld [vmem:[#allocation5 + $0x490] sm:$0xf0]  ;;  %v2838_v15 = vor.u32 %v3540_v6, %v2835_v7 }
  0x64   :  { %1523 = vmatpush.bf16.msra.mxu1 %v2870_v49  ;;  %1537 = vmatpush.bf16.msra.mxu3 %v2998_v57  ;;  %v3612_v12 = vld [vmem:[#allocation5 + $0x5c4] sm:$0xf]  ;;  %v3123_v13 = vld [vmem:[#allocation5 + $0x5d0] sm:$0xf0]  ;;  %v2966_v22 = vor.u32 %v3572_v10, %v2963_v11 }
  0x65   :  { %v3504_v16 = vld [vmem:[#allocation5 + $0x264] sm:$0xf]  ;;  %v2691_v17 = vld [vmem:[#allocation5 + $0x270] sm:$0xf0]  ;;  %v3126_v27 = vor.u32 %v3612_v12, %v3123_v13  ;;  %v2633_v12 = vld [vmem:[#allocation5 + $0x1e8] sm:$0xf] }
  0x66   :  { %1510 = vmatpush.bf16.msra.mxu0 %v2726_v0  ;;  %v3536_v18 = vld [vmem:[#allocation5 + $0x364] sm:$0xf]  ;;  %v2819_v19 = vld [vmem:[#allocation5 + $0x370] sm:$0xf0]  ;;  %1501 = vmatpush.bf16.msra.mxu2 %v2518_v8  ;;  %v2694_v32 = vor.u32 %v3504_v16, %v2691_v17  ;;  %v2505_v8 = vld [vmem:[#allocation5 + $0xe8] sm:$0xf] }
  0x67   :  { %v168_v20 = vld.sshfl [vmem:[#allocation1 + $0x20] sm:$0xff pattern:$0x75316420]  ;;  %v169_v21 = vld.sshfl [vmem:[#allocation1 + $0x28] sm:$0xff pattern:$0x75316420]  ;;  %v2822_v33 = vor.u32 %v3536_v18, %v2819_v19 }
  0x68   :  { %1524 = vmatpush.bf16.msra.mxu1 %v2854_v1  ;;  %1538 = vmatpush.bf16.msra.mxu3 %v2982_v4  ;;  %v3912_v23 = vpack.c.bf16 %v168_v20, %v153_v53  ;;  %v3914_v24 = vpack.c.bf16 %v169_v21, %v154_v54  ;;  %v3568_v28 = vld [vmem:[#allocation5 + $0x464] sm:$0xf]  ;;  %v2947_v29 = vld [vmem:[#allocation5 + $0x470] sm:$0xf0]  ;;  %v3491_v13 = vld [vmem:[#allocation5 + $0x1f4] sm:$0xf0] }
  0x69   :  { %v3608_v30 = vld [vmem:[#allocation5 + $0x5a4] sm:$0xf]  ;;  %v3107_v31 = vld [vmem:[#allocation5 + $0x5b0] sm:$0xf0]  ;;  %v2950_v40 = vor.u32 %v3568_v28, %v2947_v29  ;;  %v2761_v18 = vld [vmem:[#allocation5 + $0x2e8] sm:$0xf] }
  0x6a   :  { %1550 = vmatpush.bf16.msrb.mxu2 %v3142_v9  ;;  %1511 = vmatpush.bf16.msra.mxu0 %v2710_v14  ;;  %v3500_v34 = vld [vmem:[#allocation5 + $0x244] sm:$0xf]  ;;  %v2675_v35 = vld [vmem:[#allocation5 + $0x250] sm:$0xf0]  ;;  %v3110_v41 = vor.u32 %v3608_v30, %v3107_v31  ;;  %v3459_v9 = vld [vmem:[#allocation5 + $0xf4] sm:$0xf0] }
  0x6b   :  { %1446 = vmatmul.bf16.vlgmr.msrb.gmra.mxu0 %v3912_v23  ;;  %1460 = vmatmul.bf16.vlgmr.msrb.gmra.mxu1 %v3914_v24  ;;  %v3532_v36 = vld [vmem:[#allocation5 + $0x344] sm:$0xf]  ;;  %v2803_v39 = vld [vmem:[#allocation5 + $0x350] sm:$0xf0]  ;;  %v2678_v46 = vor.u32 %v3500_v34, %v2675_v35  ;;  %v2506_v17 = vor.u32 %v3459_v9, %v2505_v8  ;;  %v3523_v19 = vld [vmem:[#allocation5 + $0x2f4] sm:$0xf0] }
  0x6c   :  { %1525 = vmatpush.bf16.msra.mxu1 %v2838_v15  ;;  %1539 = vmatpush.bf16.msra.mxu3 %v2966_v22  ;;  %v3564_v42 = vld [vmem:[#allocation5 + $0x444] sm:$0xf]  ;;  %v2931_v43 = vld [vmem:[#allocation5 + $0x450] sm:$0xf0]  ;;  %v2806_v47 = vor.u32 %v3532_v36, %v2803_v39  ;;  %v2634_v22 = vor.u32 %v3491_v13, %v2633_v12  ;;  %v3455_v28 = vld [vmem:[#allocation5 + $0xd4] sm:$0xf0] }
  0x6d   :  { %v3604_v44 = vld [vmem:[#allocation5 + $0x584] sm:$0xf]  ;;  %v3091_v45 = vld [vmem:[#allocation5 + $0x590] sm:$0xf0]  ;;  %v2934_v50 = vor.u32 %v3564_v42, %v2931_v43  ;;  %v2617_v30 = vld [vmem:[#allocation5 + $0x1c8] sm:$0xf] }
  0x6e   :  { %1551 = vmatpush.bf16.msrb.mxu2 %v3126_v27  ;;  %1512 = vmatpush.bf16.msra.mxu0 %v2694_v32  ;;  %v3496_v48 = vld [vmem:[#allocation5 + $0x224] sm:$0xf]  ;;  %v2659_v49 = vld [vmem:[#allocation5 + $0x230] sm:$0xf0]  ;;  %v3094_v53 = vor.u32 %v3604_v44, %v3091_v45  ;;  %v2489_v27 = vld [vmem:[#allocation5 + $0xc8] sm:$0xf]  ;;  %v2762_v32 = vor.u32 %v3523_v19, %v2761_v18 }
  0x6f   :  { %v3528_v51 = vld [vmem:[#allocation5 + $0x324] sm:$0xf]  ;;  %v2787_v52 = vld [vmem:[#allocation5 + $0x330] sm:$0xf0]  ;;  %v2662_v58 = vor.u32 %v3496_v48, %v2659_v49  ;;  %v3487_v31 = vld [vmem:[#allocation5 + $0x1d4] sm:$0xf0] }
  0x70   :  { %1526 = vmatpush.bf16.msra.mxu1 %v2822_v33  ;;  %1540 = vmatpush.bf16.msra.mxu3 %v2950_v40  ;;  %v3560_v54 = vld [vmem:[#allocation5 + $0x424] sm:$0xf]  ;;  %v2915_v55 = vld [vmem:[#allocation5 + $0x430] sm:$0xf0]  ;;  %v2790_v60 = vor.u32 %v3528_v51, %v2787_v52  ;;  %v2490_v33 = vor.u32 %v3455_v28, %v2489_v27  ;;  %v2745_v34 = vld [vmem:[#allocation5 + $0x2c8] sm:$0xf]  ;;  %v2618_v40 = vor.u32 %v3487_v31, %v2617_v30 }
  0x71   :  { %v3600_v56 = vld [vmem:[#allocation5 + $0x564] sm:$0xf]  ;;  %v3075_v57 = vld [vmem:[#allocation5 + $0x570] sm:$0xf0]  ;;  %v2918_v1 = vor.u32 %v3560_v54, %v2915_v55  ;;  %v3519_v35 = vld [vmem:[#allocation5 + $0x2d4] sm:$0xf0] }
  0x72   :  { %1552 = vmatpush.bf16.msrb.mxu2 %v3110_v41  ;;  %1513 = vmatpush.bf16.msra.mxu0 %v2678_v46  ;;  %v3492_v59 = vld [vmem:[#allocation5 + $0x204] sm:$0xf]  ;;  %v2643_v61 = vld [vmem:[#allocation5 + $0x210] sm:$0xf0]  ;;  %v3078_v6 = vor.u32 %v3600_v56, %v3075_v57  ;;  %v2473_v41 = vld [vmem:[#allocation5 + $0xa8] sm:$0xf]  ;;  %v2746_v48 = vor.u32 %v3519_v35, %v2745_v34 }
  0x73   :  { %v3524_v62 = vld [vmem:[#allocation5 + $0x304] sm:$0xf]  ;;  %v2771_v63 = vld [vmem:[#allocation5 + $0x310] sm:$0xf0]  ;;  %1502 = vmatmul.bf16.vlgmr.msra.gmra.mxu2 %v3903_v38  ;;  %v2646_v11 = vor.u32 %v3492_v59, %v2643_v61  ;;  %v3451_v42 = vld [vmem:[#allocation5 + $0xb4] sm:$0xf0] }
  0x74   :  { %1527 = vmatpush.bf16.msra.mxu1 %v2806_v47  ;;  %1541 = vmatpush.bf16.msra.mxu3 %v2934_v50  ;;  %v3596_v0 = vld [vmem:[#allocation5 + $0x544] sm:$0xf]  ;;  %v3155_v5 = vld [vmem:[#allocation5 + $0x610] sm:$0xf0]  ;;  %v2774_v14 = vor.u32 %v3524_v62, %v2771_v63  ;;  %v2601_v44 = vld [vmem:[#allocation5 + $0x1a8] sm:$0xf]  ;;  %v2474_v49 = vor.u32 %v3451_v42, %v2473_v41 }
  0x75   :  { %v3556_v2 = vld [vmem:[#allocation5 + $0x404] sm:$0xf]  ;;  %v2899_v7 = vld [vmem:[#allocation5 + $0x410] sm:$0xf0]  ;;  %v3483_v45 = vld [vmem:[#allocation5 + $0x1b4] sm:$0xf0] }
  0x76   :  { %v3620_v4 = vld [vmem:[#allocation5 + $0x604] sm:$0xf]  ;;  %1553 = vmatpush.bf16.msrb.mxu2 %v3094_v53  ;;  %v3059_v10 = vld [vmem:[#allocation5 + $0x550] sm:$0xf0]  ;;  %1514 = vmatpush.bf16.msra.mxu0 %v2662_v58  ;;  %v2902_v16 = vor.u32 %v3556_v2, %v2899_v7  ;;  %v2889_v46 = vld [vmem:[#allocation5 + $0x3e8] sm:$0xf]  ;;  %v2602_v53 = vor.u32 %v3483_v45, %v2601_v44 }
  0x77   :  { %v3158_v15 = vor.u32 %v3620_v4, %v3155_v5  ;;  %v3062_v20 = vor.u32 %v3596_v0, %v3059_v10  ;;  %v3592_v21 = vld [vmem:[#allocation5 + $0x524] sm:$0xf]  ;;  %v3043_v29 = vld [vmem:[#allocation5 + $0x530] sm:$0xf0]  ;;  %v3555_v47 = vld [vmem:[#allocation5 + $0x3f4] sm:$0xf0] }
  0x78   :  { %1528 = vmatpush.bf16.msra.mxu1 %v2790_v60  ;;  %1542 = vmatpush.bf16.msra.mxu3 %v2918_v1  ;;  %v3046_v36 = vor.u32 %v3592_v21, %v3043_v29  ;;  %v3588_v39 = vld [vmem:[#allocation5 + $0x504] sm:$0xf]  ;;  %v3027_v43 = vld [vmem:[#allocation5 + $0x510] sm:$0xf0]  ;;  %v2729_v50 = vld [vmem:[#allocation5 + $0x2a8] sm:$0xf]  ;;  %v2890_v56 = vor.u32 %v3555_v47, %v2889_v46 }
  0x79   :  { %v3515_v51 = vld [vmem:[#allocation5 + $0x2b4] sm:$0xf0]  ;;  %v3030_v52 = vor.u32 %v3588_v39, %v3027_v43  ;;  %v2457_v54 = vld [vmem:[#allocation5 + $0x88] sm:$0xf] }
  0x7a   :  { %1554 = vmatpush.bf16.msrb.mxu2 %v3078_v6  ;;  %1515 = vmatpush.bf16.msra.mxu0 %v2646_v11  ;;  %v3447_v55 = vld [vmem:[#allocation5 + $0x94] sm:$0xf0]  ;;  %v2585_v57 = vld [vmem:[#allocation5 + $0x188] sm:$0xf]  ;;  %v2730_v61 = vor.u32 %v3515_v51, %v2729_v50 }
  0x7b   :  { %v3479_v58 = vld [vmem:[#allocation5 + $0x194] sm:$0xf0]  ;;  %v2873_v59 = vld [vmem:[#allocation5 + $0x3c8] sm:$0xf]  ;;  %v2458_v62 = vor.u32 %v3447_v55, %v2457_v54 }
  0x7c   :  { %1529 = vmatpush.bf16.msra.mxu1 %v2774_v14  ;;  %1543 = vmatpush.bf16.msra.mxu3 %v2902_v16  ;;  %v3551_v60 = vld [vmem:[#allocation5 + $0x3d4] sm:$0xf0]  ;;  %v2713_v63 = vld [vmem:[#allocation5 + $0x288] sm:$0xf]  ;;  %v2586_v1 = vor.u32 %v3479_v58, %v2585_v57 }
  0x7d   :  { %1516 = vmatmul.bf16.vlgmr.msra.gmra.mxu0 %v3895_v25  ;;  %v3511_v0 = vld [vmem:[#allocation5 + $0x294] sm:$0xf0]  ;;  %v2441_v2 = vld [vmem:[#allocation5 + $0x68] sm:$0xf]  ;;  %v2874_v5 = vor.u32 %v3551_v60, %v2873_v59 }
  0x7e   :  { %1571 = vmatpush.bf16.msrb.mxu0 %v3158_v15  ;;  %1555 = vmatpush.bf16.msrb.mxu2 %v3062_v20  ;;  %v3443_v4 = vld [vmem:[#allocation5 + $0x74] sm:$0xf0]  ;;  %v2569_v6 = vld [vmem:[#allocation5 + $0x168] sm:$0xf]  ;;  %v2714_v10 = vor.u32 %v3511_v0, %v2713_v63 }
  0x7f   :  { %1530 = vmatmul.bf16.vlgmr.msra.gmra.mxu1 %v3897_v26  ;;  %1544 = vmatmul.bf16.vlgmr.msra.gmra.mxu3 %v3912_v23  ;;  %v3475_v7 = vld [vmem:[#allocation5 + $0x174] sm:$0xf0]  ;;  %v2857_v8 = vld [vmem:[#allocation5 + $0x3a8] sm:$0xf]  ;;  %v2442_v11 = vor.u32 %v3443_v4, %v2441_v2 }
  0x80   :  { %1578 = vmatpush.bf16.msrb.mxu1 %v2506_v17  ;;  %1592 = vmatpush.bf16.msrb.mxu3 %v2634_v22  ;;  %v3547_v9 = vld [vmem:[#allocation5 + $0x3b4] sm:$0xf0]  ;;  %v2697_v12 = vld [vmem:[#allocation5 + $0x268] sm:$0xf]  ;;  %v2570_v14 = vor.u32 %v3475_v7, %v2569_v6 }
  0x81   :  { %v3507_v13 = vld [vmem:[#allocation5 + $0x274] sm:$0xf0]  ;;  %v2425_v15 = vld [vmem:[#allocation5 + $0x48] sm:$0xf]  ;;  %v2858_v17 = vor.u32 %v3547_v9, %v2857_v8 }
  0x82   :  { %1606 = vmatpush.bf16.msra.mxu0 %v2762_v32  ;;  %1556 = vmatpush.bf16.msrb.mxu2 %v3046_v36  ;;  %v3439_v16 = vld [vmem:[#allocation5 + $0x54] sm:$0xf0]  ;;  %v2553_v18 = vld [vmem:[#allocation5 + $0x148] sm:$0xf]  ;;  %v2698_v22 = vor.u32 %v3507_v13, %v2697_v12  ;;  %v3489_v12 = vld [vmem:[#allocation5 + $0x1ec] sm:$0xf] }
  0x83   :  { %v3471_v19 = vld [vmem:[#allocation5 + $0x154] sm:$0xf0]  ;;  %v2841_v20 = vld [vmem:[#allocation5 + $0x388] sm:$0xf]  ;;  %v2426_v27 = vor.u32 %v3439_v16, %v2425_v15  ;;  %v2635_v13 = vld [vmem:[#allocation5 + $0x1f8] sm:$0xf0] }
  0x84   :  { %1579 = vmatpush.bf16.msrb.mxu1 %v2490_v33  ;;  %1593 = vmatpush.bf16.msrb.mxu3 %v2618_v40  ;;  %v3543_v21 = vld [vmem:[#allocation5 + $0x394] sm:$0xf0]  ;;  %v2681_v28 = vld [vmem:[#allocation5 + $0x248] sm:$0xf]  ;;  %v2554_v30 = vor.u32 %v3471_v19, %v2553_v18 }
  0x85   :  { %v3503_v29 = vld [vmem:[#allocation5 + $0x254] sm:$0xf0]  ;;  %v2409_v31 = vld [vmem:[#allocation5 + $0x28] sm:$0xf]  ;;  %v2842_v33 = vor.u32 %v3543_v21, %v2841_v20 }
  0x86   :  { %1607 = vmatpush.bf16.msra.mxu0 %v2746_v48  ;;  %1557 = vmatpush.bf16.msrb.mxu2 %v3030_v52  ;;  %v3435_v32 = vld [vmem:[#allocation5 + $0x34] sm:$0xf0]  ;;  %v2537_v34 = vld [vmem:[#allocation5 + $0x128] sm:$0xf]  ;;  %v2682_v40 = vor.u32 %v3503_v29, %v2681_v28  ;;  %v2638_v28 = vor.u32 %v3489_v12, %v2635_v13 }
  0x87   :  { %v3467_v35 = vld [vmem:[#allocation5 + $0x134] sm:$0xf0]  ;;  %v2825_v36 = vld [vmem:[#allocation5 + $0x368] sm:$0xf]  ;;  %v2410_v41 = vor.u32 %v3435_v32, %v2409_v31  ;;  %v2619_v31 = vld [vmem:[#allocation5 + $0x1d8] sm:$0xf0] }
  0x88   :  { %1580 = vmatpush.bf16.msrb.mxu1 %v2474_v49  ;;  %1594 = vmatpush.bf16.msrb.mxu3 %v2602_v53  ;;  %v3539_v39 = vld [vmem:[#allocation5 + $0x374] sm:$0xf0]  ;;  %v2665_v42 = vld [vmem:[#allocation5 + $0x228] sm:$0xf]  ;;  %v2538_v45 = vor.u32 %v3467_v35, %v2537_v34 }
  0x89   :  { %1558 = vmatmul.bf16.vlgmr.msrb.gmra.mxu2 %v3914_v24  ;;  %v3499_v43 = vld [vmem:[#allocation5 + $0x234] sm:$0xf0]  ;;  %v2809_v44 = vld [vmem:[#allocation5 + $0x348] sm:$0xf]  ;;  %v2826_v49 = vor.u32 %v3539_v39, %v2825_v36 }
  0x8a   :  { %1620 = vmatpush.bf16.msra.mxu2 %v2890_v56  ;;  %1608 = vmatpush.bf16.msra.mxu0 %v2730_v61  ;;  %v2393_v46 = vld [vmem:[#allocation5 + $0x8] sm:$0xf]  ;;  %v3431_v47 = vld [vmem:[#allocation5 + $0x14] sm:$0xf0]  ;;  %v2666_v54 = vor.u32 %v3499_v43, %v2665_v42  ;;  %v2491_v42 = vld [vmem:[#allocation5 + $0xd8] sm:$0xf0] }
  0x8b   :  { %v2521_v48 = vld [vmem:[#allocation5 + $0x108] sm:$0xf]  ;;  %v3463_v50 = vld [vmem:[#allocation5 + $0x114] sm:$0xf0]  ;;  %v2394_v57 = vor.u32 %v3431_v47, %v2393_v46  ;;  %v2603_v46 = vld [vmem:[#allocation5 + $0x1b8] sm:$0xf0] }
  0x8c   :  { %1581 = vmatpush.bf16.msrb.mxu1 %v2458_v62  ;;  %1595 = vmatpush.bf16.msrb.mxu3 %v2586_v1  ;;  %v3017_v51 = vld [vmem:[#allocation5 + $0x4e8] sm:$0xf]  ;;  %v3587_v52 = vld [vmem:[#allocation5 + $0x4f4] sm:$0xf0]  ;;  %v2522_v60 = vor.u32 %v3463_v50, %v2521_v48 }
  0x8d   :  { %3168 = vmatmul.msk.bf16.vlgmr.msrb.gmra.mxu0 %vm1378_vm0, %v3908_v3  ;;  %v3535_v53 = vld [vmem:[#allocation5 + $0x354] sm:$0xf0]  ;;  %v3145_v55 = vld [vmem:[#allocation5 + $0x5e8] sm:$0xf]  ;;  %v3018_v61 = vor.u32 %v3587_v52, %v3017_v51 }
  0x8e   :  { %1621 = vmatpush.bf16.msra.mxu2 %v2874_v5  ;;  %1609 = vmatpush.bf16.msra.mxu0 %v2714_v10  ;;  %v3619_v56 = vld [vmem:[#allocation5 + $0x5f4] sm:$0xf0]  ;;  %v2649_v58 = vld [vmem:[#allocation5 + $0x208] sm:$0xf]  ;;  %v2810_v0 = vor.u32 %v3535_v53, %v2809_v44  ;;  %v3449_v53 = vld [vmem:[#allocation5 + $0xac] sm:$0xf] }
  0x8f   :  { %v3495_v59 = vld [vmem:[#allocation5 + $0x214] sm:$0xf0]  ;;  %v3161_v62 = vld [vmem:[#allocation5 + $0x608] sm:$0xf]  ;;  %v3146_v2 = vor.u32 %v3619_v56, %v3145_v55 }
  0x90   :  { %1582 = vmatpush.bf16.msrb.mxu1 %v2442_v11  ;;  %1596 = vmatpush.bf16.msrb.mxu3 %v2570_v14  ;;  %v3623_v63 = vld [vmem:[#allocation5 + $0x614] sm:$0xf0]  ;;  %v2793_v1 = vld [vmem:[#allocation5 + $0x328] sm:$0xf]  ;;  %v2650_v7 = vor.u32 %v3495_v59, %v2649_v58  ;;  %v2587_v58 = vld [vmem:[#allocation5 + $0x198] sm:$0xf0] }
  0x91   :  { %v3001_v4 = vld [vmem:[#allocation5 + $0x4c8] sm:$0xf]  ;;  %v3583_v5 = vld [vmem:[#allocation5 + $0x4d4] sm:$0xf0]  ;;  %v3162_v10 = vor.u32 %v3623_v63, %v3161_v62 }
  0x92   :  { %1622 = vmatpush.bf16.msra.mxu2 %v2858_v17  ;;  %1610 = vmatpush.bf16.msra.mxu0 %v2698_v22  ;;  %v3531_v6 = vld [vmem:[#allocation5 + $0x334] sm:$0xf0]  ;;  %v3129_v8 = vld [vmem:[#allocation5 + $0x5c8] sm:$0xf]  ;;  %v3002_v11 = vor.u32 %v3583_v5, %v3001_v4  ;;  %v3457_v22 = vld [vmem:[#allocation5 + $0xec] sm:$0xf] }
  0x93   :  { %v3615_v9 = vld [vmem:[#allocation5 + $0x5d4] sm:$0xf0]  ;;  %v2794_v14 = vor.u32 %v3531_v6, %v2793_v1  ;;  %v2777_v15 = vld [vmem:[#allocation5 + $0x308] sm:$0xf]  ;;  %v3445_v1 = vld [vmem:[#allocation5 + $0x8c] sm:$0xf] }
  0x94   :  { %1583 = vmatpush.bf16.msrb.mxu1 %v2426_v27  ;;  %1597 = vmatpush.bf16.msrb.mxu3 %v2554_v30  ;;  %v3130_v16 = vor.u32 %v3615_v9, %v3129_v8  ;;  %v2985_v17 = vld [vmem:[#allocation5 + $0x4a8] sm:$0xf]  ;;  %v3579_v18 = vld [vmem:[#allocation5 + $0x4b4] sm:$0xf0]  ;;  %v2507_v27 = vld [vmem:[#allocation5 + $0xf8] sm:$0xf0] }
  0x95   :  { %v3527_v19 = vld [vmem:[#allocation5 + $0x314] sm:$0xf0]  ;;  %v3113_v20 = vld [vmem:[#allocation5 + $0x5a8] sm:$0xf]  ;;  %v2986_v29 = vor.u32 %v3579_v18, %v2985_v17  ;;  %v3485_v30 = vld [vmem:[#allocation5 + $0x1cc] sm:$0xf]  ;;  %v2510_v36 = vor.u32 %v3457_v22, %v2507_v27 }
  0x96   :  { %1623 = vmatpush.bf16.msra.mxu2 %v2842_v33  ;;  %1611 = vmatpush.bf16.msra.mxu0 %v2682_v40  ;;  %v3611_v21 = vld [vmem:[#allocation5 + $0x5b4] sm:$0xf0]  ;;  %v2778_v32 = vor.u32 %v3527_v19, %v2777_v15  ;;  %v2969_v34 = vld [vmem:[#allocation5 + $0x488] sm:$0xf]  ;;  %v2622_v43 = vor.u32 %v3485_v30, %v2619_v31  ;;  %v3473_v6 = vld [vmem:[#allocation5 + $0x16c] sm:$0xf] }
  0x97   :  { %v3114_v33 = vor.u32 %v3611_v21, %v3113_v20  ;;  %v3575_v35 = vld [vmem:[#allocation5 + $0x494] sm:$0xf0]  ;;  %v3097_v39 = vld [vmem:[#allocation5 + $0x588] sm:$0xf]  ;;  %v2443_v15 = vld [vmem:[#allocation5 + $0x78] sm:$0xf0] }
  0x98   :  { %1584 = vmatpush.bf16.msrb.mxu1 %v2410_v41  ;;  %1598 = vmatpush.bf16.msrb.mxu3 %v2538_v45  ;;  %v3607_v40 = vld [vmem:[#allocation5 + $0x594] sm:$0xf0]  ;;  %v3453_v41 = vld [vmem:[#allocation5 + $0xcc] sm:$0xf]  ;;  %v2970_v44 = vor.u32 %v3575_v35, %v2969_v34  ;;  %v2953_v48 = vld [vmem:[#allocation5 + $0x468] sm:$0xf] }
  0x99   :  { %v3481_v45 = vld [vmem:[#allocation5 + $0x1ac] sm:$0xf]  ;;  %v3098_v47 = vor.u32 %v3607_v40, %v3097_v39  ;;  %v2494_v50 = vor.u32 %v3453_v41, %v2491_v42  ;;  %v3081_v51 = vld [vmem:[#allocation5 + $0x568] sm:$0xf]  ;;  %v3603_v52 = vld [vmem:[#allocation5 + $0x574] sm:$0xf0] }
  0x9a   :  { %1624 = vmatpush.bf16.msra.mxu2 %v2826_v49  ;;  %1612 = vmatpush.bf16.msra.mxu0 %v2666_v54  ;;  %v3571_v49 = vld [vmem:[#allocation5 + $0x474] sm:$0xf0]  ;;  %v2475_v54 = vld [vmem:[#allocation5 + $0xb8] sm:$0xf0]  ;;  %v2606_v55 = vor.u32 %v3481_v45, %v2603_v46  ;;  %v3082_v59 = vor.u32 %v3603_v52, %v3081_v51  ;;  %v3065_v63 = vld [vmem:[#allocation5 + $0x548] sm:$0xf] }
  0x9b   :  { %v2954_v56 = vor.u32 %v3571_v49, %v2953_v48  ;;  %v2478_v62 = vor.u32 %v3449_v53, %v2475_v54  ;;  %v2921_v9 = vld [vmem:[#allocation5 + $0x428] sm:$0xf]  ;;  %v3595_v13 = vld [vmem:[#allocation5 + $0x534] sm:$0xf0]  ;;  %v3469_v18 = vld [vmem:[#allocation5 + $0x14c] sm:$0xf] }
  0x9c   :  { %1585 = vmatpush.bf16.msrb.mxu1 %v2394_v57  ;;  %1599 = vmatpush.bf16.msrb.mxu3 %v2522_v60  ;;  %v3477_v57 = vld [vmem:[#allocation5 + $0x18c] sm:$0xf]  ;;  %v2937_v60 = vld [vmem:[#allocation5 + $0x448] sm:$0xf]  ;;  %v2555_v19 = vld [vmem:[#allocation5 + $0x158] sm:$0xf0] }
  0x9d   :  { %v2590_v4 = vor.u32 %v3477_v57, %v2587_v58  ;;  %v3049_v12 = vld [vmem:[#allocation5 + $0x528] sm:$0xf]  ;;  %v3437_v20 = vld [vmem:[#allocation5 + $0x4c] sm:$0xf]  ;;  %v3559_v27 = vld [vmem:[#allocation5 + $0x414] sm:$0xf0]  ;;  %v2558_v34 = vor.u32 %v3469_v18, %v2555_v19 }
  0x9e   :  { %1625 = vmatpush.bf16.msra.mxu2 %v2810_v0  ;;  %1613 = vmatpush.bf16.msra.mxu0 %v2650_v7  ;;  %v3599_v0 = vld [vmem:[#allocation5 + $0x554] sm:$0xf0]  ;;  %v2571_v7 = vld [vmem:[#allocation5 + $0x178] sm:$0xf0]  ;;  %v3050_v21 = vor.u32 %v3595_v13, %v3049_v12  ;;  %v2905_v22 = vld [vmem:[#allocation5 + $0x408] sm:$0xf] }
  0x9f   :  { %1586 = vmatmul.bf16.vlgmr.msrb.gmra.mxu1 %v3901_v37  ;;  %1600 = vmatmul.bf16.vlgmr.msrb.gmra.mxu3 %v3903_v38  ;;  %v3066_v8 = vor.u32 %v3599_v0, %v3065_v63  ;;  %v3591_v30 = vld [vmem:[#allocation5 + $0x514] sm:$0xf0]  ;;  %v3521_v31 = vld [vmem:[#allocation5 + $0x2ec] sm:$0xf]  ;;  %v2906_v39 = vor.u32 %v3559_v27, %v2905_v22  ;;  %v2539_v41 = vld [vmem:[#allocation5 + $0x138] sm:$0xf0] }
  0xa0   :  { %1634 = vmatpush.bf16.msra.mxu1 %v3018_v61  ;;  %1648 = vmatpush.bf16.msra.mxu3 %v3146_v2  ;;  %v3567_v61 = vld [vmem:[#allocation5 + $0x454] sm:$0xf0]  ;;  %v2459_v2 = vld [vmem:[#allocation5 + $0x98] sm:$0xf0]  ;;  %v3553_v35 = vld [vmem:[#allocation5 + $0x3ec] sm:$0xf] }
  0xa1   :  { %1614 = vmatmul.bf16.vlgmr.msra.gmra.mxu0 %v3895_v25  ;;  %v2938_v5 = vor.u32 %v3567_v61, %v2937_v60  ;;  %v3465_v40 = vld [vmem:[#allocation5 + $0x12c] sm:$0xf]  ;;  %v2747_v48 = vld [vmem:[#allocation5 + $0x2d8] sm:$0xf0] }
  0xa2   :  { %1669 = vmatpush.bf16.msrb.mxu0 %v3162_v10  ;;  %1626 = vmatpush.bf16.msra.mxu2 %v2794_v14  ;;  %v3563_v10 = vld [vmem:[#allocation5 + $0x434] sm:$0xf0]  ;;  %v3441_v14 = vld [vmem:[#allocation5 + $0x6c] sm:$0xf]  ;;  %v2411_v49 = vld [vmem:[#allocation5 + $0x38] sm:$0xf0] }
  0xa3   :  { %v2922_v17 = vor.u32 %v3563_v10, %v2921_v9  ;;  %v3433_v45 = vld [vmem:[#allocation5 + $0x2c] sm:$0xf]  ;;  %v2875_v52 = vld [vmem:[#allocation5 + $0x3d8] sm:$0xf0] }
  0xa4   :  { %1635 = vmatpush.bf16.msra.mxu1 %v3002_v11  ;;  %1649 = vmatpush.bf16.msra.mxu3 %v3130_v16  ;;  %v2462_v11 = vor.u32 %v3445_v1, %v2459_v2  ;;  %v2574_v16 = vor.u32 %v3473_v6, %v2571_v7  ;;  %v3549_v51 = vld [vmem:[#allocation5 + $0x3cc] sm:$0xf]  ;;  %v2523_v54 = vld [vmem:[#allocation5 + $0x118] sm:$0xf0]  ;;  %v2414_v58 = vor.u32 %v3433_v45, %v2411_v49 }
  0xa5   :  { %v3461_v53 = vld [vmem:[#allocation5 + $0x10c] sm:$0xf]  ;;  %v3147_v57 = vld [vmem:[#allocation5 + $0x5f8] sm:$0xf0]  ;;  %v2878_v60 = vor.u32 %v3549_v51, %v2875_v52 }
  0xa6   :  { %1690 = vmatpush.bf16.msra.mxu0 %v2638_v28  ;;  %1627 = vmatpush.bf16.msra.mxu2 %v2778_v32  ;;  %v3033_v28 = vld [vmem:[#allocation5 + $0x508] sm:$0xf]  ;;  %v2763_v32 = vld [vmem:[#allocation5 + $0x2f8] sm:$0xf0]  ;;  %v3513_v61 = vld [vmem:[#allocation5 + $0x2ac] sm:$0xf]  ;;  %v2526_v0 = vor.u32 %v3461_v53, %v2523_v54 }
  0xa7   :  { %v3034_v42 = vor.u32 %v3591_v30, %v3033_v28  ;;  %v2395_v63 = vld [vmem:[#allocation5 + $0x18] sm:$0xf0]  ;;  %v3545_v1 = vld [vmem:[#allocation5 + $0x3ac] sm:$0xf] }
  0xa8   :  { %1636 = vmatpush.bf16.msra.mxu1 %v2986_v29  ;;  %1650 = vmatpush.bf16.msra.mxu3 %v3114_v33  ;;  %v2446_v29 = vor.u32 %v3441_v14, %v2443_v15  ;;  %v2427_v33 = vld [vmem:[#allocation5 + $0x58] sm:$0xf0]  ;;  %v3509_v12 = vld [vmem:[#allocation5 + $0x28c] sm:$0xf] }
  0xa9   :  { %1628 = vmatmul.bf16.vlgmr.msra.gmra.mxu2 %v3897_v26  ;;  %v2859_v2 = vld [vmem:[#allocation5 + $0x3b8] sm:$0xf0]  ;;  %v3541_v15 = vld [vmem:[#allocation5 + $0x38c] sm:$0xf] }
  0xaa   :  { %1676 = vmatpush.bf16.msrb.mxu2 %v2510_v36  ;;  %1691 = vmatpush.bf16.msra.mxu0 %v2622_v43  ;;  %v2891_v36 = vld [vmem:[#allocation5 + $0x3f8] sm:$0xf0]  ;;  %v2766_v43 = vor.u32 %v3521_v31, %v2763_v32  ;;  %v3505_v28 = vld [vmem:[#allocation5 + $0x26c] sm:$0xf] }
  0xab   :  { %v2894_v46 = vor.u32 %v3553_v35, %v2891_v36  ;;  %v3131_v9 = vld [vmem:[#allocation5 + $0x5d8] sm:$0xf0]  ;;  %v3537_v31 = vld [vmem:[#allocation5 + $0x36c] sm:$0xf] }
  0xac   :  { %1637 = vmatpush.bf16.msra.mxu1 %v2970_v44  ;;  %1651 = vmatpush.bf16.msra.mxu3 %v3098_v47  ;;  %v2430_v44 = vor.u32 %v3437_v20, %v2427_v33  ;;  %v3517_v47 = vld [vmem:[#allocation5 + $0x2cc] sm:$0xf]  ;;  %v2715_v13 = vld [vmem:[#allocation5 + $0x298] sm:$0xf0] }
  0xad   :  { %v3003_v18 = vld [vmem:[#allocation5 + $0x4d8] sm:$0xf0]  ;;  %v2718_v20 = vor.u32 %v3509_v12, %v2715_v13  ;;  %v3577_v33 = vld [vmem:[#allocation5 + $0x4ac] sm:$0xf] }
  0xae   :  { %1677 = vmatpush.bf16.msrb.mxu2 %v2494_v50  ;;  %1692 = vmatpush.bf16.msra.mxu0 %v2606_v55  ;;  %v2542_v50 = vor.u32 %v3465_v40, %v2539_v41  ;;  %v2750_v55 = vor.u32 %v3517_v47, %v2747_v48  ;;  %v3115_v22 = vld [vmem:[#allocation5 + $0x5b8] sm:$0xf0]  ;;  %v3533_v45 = vld [vmem:[#allocation5 + $0x34c] sm:$0xf] }
  0xaf   :  { %v2827_v32 = vld [vmem:[#allocation5 + $0x378] sm:$0xf0]  ;;  %v3497_v52 = vld [vmem:[#allocation5 + $0x22c] sm:$0xf] }
  0xb0   :  { %1638 = vmatpush.bf16.msra.mxu1 %v2954_v56  ;;  %1652 = vmatpush.bf16.msra.mxu3 %v3082_v59  ;;  %v3617_v56 = vld [vmem:[#allocation5 + $0x5ec] sm:$0xf]  ;;  %v3099_v40 = vld [vmem:[#allocation5 + $0x598] sm:$0xf0]  ;;  %v2830_v41 = vor.u32 %v3537_v31, %v2827_v32  ;;  %v3935_v31 = vld [vmem:[#allocation7] sm:$0xf] }
  0xb1   :  { %3169 = vmatmul.msk.bf16.vlgmr.msrb.gmra.mxu0 %vm1378_vm0, %v3908_v3  ;;  %v3429_v59 = vld [vmem:[#allocation5 + $0xc] sm:$0xf]  ;;  %v3150_v6 = vor.u32 %v3617_v56, %v3147_v57  ;;  %v2971_v47 = vld [vmem:[#allocation5 + $0x498] sm:$0xf0] }
  0xb2   :  { %1678 = vmatpush.bf16.msrb.mxu2 %v2478_v62  ;;  %1693 = vmatpush.bf16.msra.mxu0 %v2590_v4  ;;  %v2731_v62 = vld [vmem:[#allocation5 + $0x2b8] sm:$0xf0]  ;;  %v3585_v4 = vld [vmem:[#allocation5 + $0x4ec] sm:$0xf]  ;;  %v2398_v10 = vor.u32 %v3429_v59, %v2395_v63 }
  0xb3   :  { %v2734_v7 = vor.u32 %v3513_v61, %v2731_v62  ;;  %v3083_v51 = vld [vmem:[#allocation5 + $0x578] sm:$0xf0]  ;;  %v3569_v57 = vld [vmem:[#allocation5 + $0x46c] sm:$0xf] }
  0xb4   :  { %1639 = vmatpush.bf16.msra.mxu1 %v2938_v5  ;;  %1653 = vmatpush.bf16.msra.mxu3 %v3066_v8  ;;  %v3019_v5 = vld [vmem:[#allocation5 + $0x4f8] sm:$0xf0]  ;;  %v3613_v8 = vld [vmem:[#allocation5 + $0x5cc] sm:$0xf] }
  0xb5   :  { %v3022_v14 = vor.u32 %v3585_v4, %v3019_v5  ;;  %v3134_v19 = vor.u32 %v3613_v8, %v3131_v9  ;;  %v2667_v53 = vld [vmem:[#allocation5 + $0x238] sm:$0xf0]  ;;  %v3597_v61 = vld [vmem:[#allocation5 + $0x54c] sm:$0xf] }
  0xb6   :  { %1679 = vmatpush.bf16.msrb.mxu2 %v2462_v11  ;;  %1694 = vmatpush.bf16.msra.mxu0 %v2574_v16  ;;  %v2862_v11 = vor.u32 %v3545_v1, %v2859_v2  ;;  %v2843_v16 = vld [vmem:[#allocation5 + $0x398] sm:$0xf0]  ;;  %v3565_v63 = vld [vmem:[#allocation5 + $0x44c] sm:$0xf] }
  0xb7   :  { %v2846_v27 = vor.u32 %v3541_v15, %v2843_v16  ;;  %v2795_v56 = vld [vmem:[#allocation5 + $0x338] sm:$0xf0]  ;;  %v3493_v1 = vld [vmem:[#allocation5 + $0x20c] sm:$0xf] }
  0xb8   :  { %1640 = vmatpush.bf16.msra.mxu1 %v2922_v17  ;;  %1654 = vmatpush.bf16.msra.mxu3 %v3050_v21  ;;  %v3581_v17 = vld [vmem:[#allocation5 + $0x4cc] sm:$0xf]  ;;  %v3067_v62 = vld [vmem:[#allocation5 + $0x558] sm:$0xf0] }
  0xb9   :  { %v3609_v21 = vld [vmem:[#allocation5 + $0x5ac] sm:$0xf]  ;;  %v3006_v30 = vor.u32 %v3581_v17, %v3003_v18  ;;  %v2651_v2 = vld [vmem:[#allocation5 + $0x218] sm:$0xf0] }
  0xba   :  { %1680 = vmatpush.bf16.msrb.mxu2 %v2446_v29  ;;  %1695 = vmatpush.bf16.msra.mxu0 %v2558_v34  ;;  %v2699_v29 = vld [vmem:[#allocation5 + $0x278] sm:$0xf0]  ;;  %v3118_v35 = vor.u32 %v3609_v21, %v3115_v22  ;;  %v3525_v4 = vld [vmem:[#allocation5 + $0x30c] sm:$0xf]  ;;  %v2654_v13 = vor.u32 %v3493_v1, %v2651_v2 }
  0xbb   :  { %v2987_v34 = vld [vmem:[#allocation5 + $0x4b8] sm:$0xf0]  ;;  %v2702_v36 = vor.u32 %v3505_v28, %v2699_v29  ;;  %v3637_v28 = vld [vmem:[#allocation8 + $0x64] sm:$0xf0] }
  0xbc   :  { %1641 = vmatpush.bf16.msra.mxu1 %v2906_v39  ;;  %1655 = vmatpush.bf16.msra.mxu3 %v3034_v42  ;;  %v3605_v39 = vld [vmem:[#allocation5 + $0x58c] sm:$0xf]  ;;  %v3163_v8 = vld [vmem:[#allocation5 + $0x618] sm:$0xf0] }
  0xbd   :  { %v3501_v42 = vld [vmem:[#allocation5 + $0x24c] sm:$0xf]  ;;  %v3102_v48 = vor.u32 %v3605_v39, %v3099_v40  ;;  %v2939_v9 = vld [vmem:[#allocation5 + $0x458] sm:$0xf0] }
  0xbe   :  { %1681 = vmatpush.bf16.msrb.mxu2 %v2430_v44  ;;  %1696 = vmatpush.bf16.msra.mxu0 %v2542_v50  ;;  %v2990_v44 = vor.u32 %v3577_v33, %v2987_v34  ;;  %v3601_v50 = vld [vmem:[#allocation5 + $0x56c] sm:$0xf]  ;;  %v3639_v12 = vld [vmem:[#allocation8 + $0x74] sm:$0xf0]  ;;  %v2942_v18 = vor.u32 %v3565_v63, %v2939_v9  ;;  %v3181_v9 = vld [vmem:[#allocation8 + $0x10] sm:$0xf] }
  0xbf   :  { %1642 = vmatmul.bf16.vlgmr.msra.gmra.mxu1 %v3912_v23  ;;  %1656 = vmatmul.bf16.vlgmr.msra.gmra.mxu3 %v3914_v24  ;;  %v3086_v59 = vor.u32 %v3601_v50, %v3083_v51  ;;  %v3051_v15 = vld [vmem:[#allocation5 + $0x538] sm:$0xf0]  ;;  %v3589_v29 = vld [vmem:[#allocation5 + $0x50c] sm:$0xf]  ;;  %v3285_v50 = vld [vmem:[#allocation8 + $0xe0] sm:$0xf] }
  0xc0   :  { %1704 = vmatpush.bf16.msrb.mxu1 %v2766_v43  ;;  %1718 = vmatpush.bf16.msrb.mxu3 %v2894_v46  ;;  %v2683_v43 = vld [vmem:[#allocation5 + $0x258] sm:$0xf0]  ;;  %v3557_v34 = vld [vmem:[#allocation5 + $0x40c] sm:$0xf] }
  0xc1   :  { %v2811_v46 = vld [vmem:[#allocation5 + $0x358] sm:$0xf0]  ;;  %v2686_v49 = vor.u32 %v3501_v42, %v2683_v43  ;;  %v3293_v43 = vld [vmem:[#allocation8 + $0xf0] sm:$0xf]  ;;  %v3653_v51 = vld [vmem:[#allocation8 + $0xe4] sm:$0xf0] }
  0xc2   :  { %1682 = vmatpush.bf16.msrb.mxu2 %v2414_v58  ;;  %1697 = vmatpush.bf16.msra.mxu0 %v2526_v0  ;;  %v2955_v58 = vld [vmem:[#allocation5 + $0x478] sm:$0xf0]  ;;  %v3629_v2 = vld [vmem:[#allocation8 + $0x24] sm:$0xf0] }
  0xc3   :  { %v2958_v5 = vor.u32 %v3569_v57, %v2955_v58  ;;  %v2923_v21 = vld [vmem:[#allocation5 + $0x438] sm:$0xf0] }
  0xc4   :  { %1705 = vmatpush.bf16.msrb.mxu1 %v2750_v55  ;;  %1719 = vmatpush.bf16.msrb.mxu3 %v2878_v60  ;;  %v3529_v55 = vld [vmem:[#allocation5 + $0x32c] sm:$0xf]  ;;  %v2670_v60 = vor.u32 %v3497_v52, %v2667_v53  ;;  %v3635_v42 = vld [vmem:[#allocation8 + $0x54] sm:$0xf0]  ;;  %v3277_v52 = vld [vmem:[#allocation8 + $0xd0] sm:$0xf] }
  0xc5   :  { %1698 = vmatmul.bf16.vlgmr.msra.gmra.mxu0 %v3903_v38  ;;  %v3573_v38 = vld [vmem:[#allocation5 + $0x48c] sm:$0xf]  ;;  %v2798_v0 = vor.u32 %v3529_v55, %v2795_v56  ;;  %v3651_v53 = vld [vmem:[#allocation8 + $0xd4] sm:$0xf0]  ;;  %v3197_v56 = vld [vmem:[#allocation8 + $0x30] sm:$0xf] }
  0xc6   :  { %1746 = vmatpush.bf16.msrb.mxu0 %v3150_v6  ;;  %1683 = vmatpush.bf16.msrb.mxu2 %v2398_v10  ;;  %v2974_v54 = vor.u32 %v3573_v38, %v2971_v47  ;;  %v2779_v6 = vld [vmem:[#allocation5 + $0x318] sm:$0xf0]  ;;  %v3070_v10 = vor.u32 %v3597_v61, %v3067_v62  ;;  %v3278_v58 = vor.u32 %v3651_v53, %v3277_v52  ;;  %v3649_v61 = vld [vmem:[#allocation8 + $0xc4] sm:$0xf0]  ;;  %v3654_v52 = vld [vmem:[#allocation8 + $0xf4] sm:$0xf] }
  0xc7   :  { %v2782_v16 = vor.u32 %v3525_v4, %v2779_v6  ;;  %v3631_v57 = vld [vmem:[#allocation8 + $0x34] sm:$0xf0]  ;;  %v3295_v53 = vld [vmem:[#allocation8 + $0xf8] sm:$0xf0] }
  0xc8   :  { %1706 = vmatpush.bf16.msrb.mxu1 %v2734_v7  ;;  %1720 = vmatpush.bf16.msrb.mxu3 %v2862_v11  ;;  %v3621_v7 = vld [vmem:[#allocation5 + $0x60c] sm:$0xf]  ;;  %v3229_v11 = vld [vmem:[#allocation8 + $0x70] sm:$0xf]  ;;  %v3198_v1 = vor.u32 %v3631_v57, %v3197_v56 }
  0xc9   :  { %1684 = vmatmul.bf16.vlgmr.msrb.gmra.mxu2 %v3901_v37  ;;  %v2814_v37 = vor.u32 %v3533_v45, %v2811_v46  ;;  %v3166_v17 = vor.u32 %v3621_v7, %v3163_v8  ;;  %v3655_v46 = vld [vmem:[#allocation8 + $0xf4] sm:$0xf0]  ;;  %v3261_v7 = vld [vmem:[#allocation8 + $0xb0] sm:$0xf] }
  0xca   :  { %1732 = vmatpush.bf16.msra.mxu2 %v3022_v14  ;;  %1747 = vmatpush.bf16.msrb.mxu0 %v3134_v19  ;;  %v3593_v14 = vld [vmem:[#allocation5 + $0x52c] sm:$0xf]  ;;  %v3294_v47 = vor.u32 %v3655_v46, %v3293_v43  ;;  %v3647_v8 = vld [vmem:[#allocation8 + $0xb4] sm:$0xf0]  ;;  %v3223_v43 = vld [vmem:[#allocation8 + $0x68] sm:$0xf0] }
  0xcb   :  { %v3561_v19 = vld [vmem:[#allocation5 + $0x42c] sm:$0xf]  ;;  %v3054_v22 = vor.u32 %v3593_v14, %v3051_v15  ;;  %v3253_v15 = vld [vmem:[#allocation8 + $0xa0] sm:$0xf] }
  0xcc   :  { %1707 = vmatpush.bf16.msrb.mxu1 %v2718_v20  ;;  %1721 = vmatpush.bf16.msrb.mxu3 %v2846_v27  ;;  %v3230_v20 = vor.u32 %v3639_v12, %v3229_v11  ;;  %v3221_v27 = vld [vmem:[#allocation8 + $0x60] sm:$0xf]  ;;  %v2926_v32 = vor.u32 %v3561_v19, %v2923_v21  ;;  %v1391_v39 = vpop.f32.mrf.mxu0  ;;  %v1405_v40 = vpop.f32.mrf.mxu1  ;;  %v3262_v11 = vor.u32 %v3647_v8, %v3261_v7  ;;  %v3630_v8 = vld [vmem:[#allocation8 + $0x34] sm:$0xf] }
  0xcd   :  { %v3222_v33 = vor.u32 %v3637_v28, %v3221_v27  ;;  %v1419_v45 = vpop.f32.mrf.mxu2  ;;  %v3625_v27 = vld [vmem:[#allocation8 + $0x4] sm:$0xf0] }
  0xce   :  { %1733 = vmatpush.bf16.msra.mxu2 %v3006_v30  ;;  %1748 = vmatpush.bf16.msrb.mxu0 %v3118_v35  ;;  %v3035_v30 = vld [vmem:[#allocation5 + $0x518] sm:$0xf0] }
  0xcf   :  { %v2907_v35 = vld [vmem:[#allocation5 + $0x418] sm:$0xf0] }
  0xd0   :  { %1708 = vmatpush.bf16.msrb.mxu1 %v2702_v36  ;;  %1722 = vmatpush.bf16.msrb.mxu3 %v2830_v41  ;;  %v3038_v36 = vor.u32 %v3589_v29, %v3035_v30  ;;  %v3213_v41 = vld [vmem:[#allocation8 + $0x50] sm:$0xf]  ;;  %v2910_v38 = vor.u32 %v3557_v34, %v2907_v35  ;;  %v3638_v29 = vld [vmem:[#allocation8 + $0x74] sm:$0xf]  ;;  %v3231_v30 = vld [vmem:[#allocation8 + $0x78] sm:$0xf0] }
  0xd2   :  { %1734 = vmatpush.bf16.msra.mxu2 %v2990_v44  ;;  %1749 = vmatpush.bf16.msrb.mxu0 %v3102_v48  ;;  %v390_v44 = vperm.slane %v3935_v31, 0  ;;  %v3205_v48 = vld [vmem:[#allocation8 + $0x40] sm:$0xf] }
  0xd4   :  { %1709 = vmatpush.bf16.msrb.mxu1 %v2686_v49  ;;  %1723 = vmatpush.bf16.msrb.mxu3 %v2814_v37  ;;  %v3633_v49 = vld [vmem:[#allocation8 + $0x44] sm:$0xf0]  ;;  %v1392_v37 = vadd.f32 %v1391_v39, %v390_v44  ;;  %v1393_v62 = vpop.f32.mrf.mxu0  ;;  %v1407_v63 = vpop.f32.mrf.mxu1 }
  0xd5   :  { %v3206_v55 = vor.u32 %v3633_v49, %v3205_v48  ;;  %v1394_v6 = vadd.f32 %v1393_v62, %v390_v44  ;;  %v3237_v48 = vld [vmem:[#allocation8 + $0x80] sm:$0xf]  ;;  %v3641_v49 = vld [vmem:[#allocation8 + $0x84] sm:$0xf0] }
  0xd6   :  { %1735 = vmatpush.bf16.msra.mxu2 %v2974_v54  ;;  %1750 = vmatpush.bf16.msrb.mxu0 %v3086_v59  ;;  %v1433_v54 = vpop.f32.mrf.mxu3  ;;  %v1406_v59 = vadd.f32 %v1405_v40, %v1392_v37  ;;  %v3215_v37 = vld [vmem:[#allocation8 + $0x58] sm:$0xf0] }
  0xd8   :  { %1710 = vmatpush.bf16.msrb.mxu1 %v2670_v60  ;;  %1724 = vmatpush.bf16.msrb.mxu3 %v2798_v0  ;;  %v3269_v60 = vld [vmem:[#allocation8 + $0xc0] sm:$0xf]  ;;  %v1421_v0 = vpop.f32.mrf.mxu2 }
  0xd9   :  { %v3270_v4 = vor.u32 %v3649_v61, %v3269_v60  ;;  %v3632_v61 = vld [vmem:[#allocation8 + $0x44] sm:$0xf] }
  0xda   :  { %1736 = vmatpush.bf16.msra.mxu2 %v2958_v5  ;;  %1751 = vmatpush.bf16.msrb.mxu0 %v3070_v10  ;;  %v1420_v5 = vadd.f32 %v1419_v45, %v1406_v59  ;;  %v3627_v10 = vld [vmem:[#allocation8 + $0x14] sm:$0xf0]  ;;  %v391_v59 = vperm.slane %v3935_v31, 1 }
  0xdb   :  { %v3182_v21 = vor.u32 %v3627_v10, %v3181_v9  ;;  %v3199_v9 = vld [vmem:[#allocation8 + $0x38] sm:$0xf0]  ;;  %v3650_v10 = vld [vmem:[#allocation8 + $0xd4] sm:$0xf] }
  0xdc   :  { %1711 = vmatpush.bf16.msrb.mxu1 %v2654_v13  ;;  %1725 = vmatpush.bf16.msrb.mxu3 %v2782_v16  ;;  %v1434_v12 = vadd.f32 %v1433_v54, %v1420_v5  ;;  %v1408_v13 = vadd.f32 %v1407_v63, %v1394_v6  ;;  %v3645_v16 = vld [vmem:[#allocation8 + $0xa4] sm:$0xf0]  ;;  %v3652_v54 = vld [vmem:[#allocation8 + $0xe4] sm:$0xf]  ;;  %v3207_v63 = vld [vmem:[#allocation8 + $0x48] sm:$0xf0] }
  0xdd   :  { %v3210_v7 = vor.u32 %v3632_v61, %v3207_v63  ;;  %v3239_v61 = vld [vmem:[#allocation8 + $0x88] sm:$0xf0] }
  0xde   :  { %1737 = vmatpush.bf16.msra.mxu2 %v2942_v18  ;;  %1752 = vmatpush.bf16.msrb.mxu0 %v3054_v22  ;;  %v1435_v14 = vpop.f32.mrf.mxu3  ;;  %v3173_v22 = vld [vmem:[#allocation8] sm:$0xf]  ;;  %v1422_v28 = vadd.f32 %v1421_v0, %v1408_v13  ;;  %v3648_v13 = vld [vmem:[#allocation8 + $0xc4] sm:$0xf] }
  0xdf   :  { %1712 = vmatmul.bf16.vlgmr.msrb.gmra.mxu1 %v3895_v25  ;;  %1726 = vmatmul.bf16.vlgmr.msrb.gmra.mxu3 %v3897_v26  ;;  %v3214_v25 = vor.u32 %v3635_v42, %v3213_v41  ;;  %v3286_v26 = vor.u32 %v3653_v51, %v3285_v50  ;;  %v3174_v35 = vor.u32 %v3625_v27, %v3173_v22  ;;  %v3636_v42 = vld [vmem:[#allocation8 + $0x64] sm:$0xf]  ;;  %v3634_v51 = vld [vmem:[#allocation8 + $0x54] sm:$0xf]  ;;  %v3263_v27 = vld [vmem:[#allocation8 + $0xb8] sm:$0xf0] }
  0xe0   :  { %1767 = vmatpush.bf16.msra.mxu1 %v3166_v17  ;;  %2192 = vmatpush.bf16.msra.mxu3 %v3230_v20  ;;  %v1436_v40 = vadd.f32 %v1435_v14, %v1422_v28  ;;  %v3218_v60 = vor.u32 %v3634_v51, %v3215_v37  ;;  %v3271_v14 = vld [vmem:[#allocation8 + $0xc8] sm:$0xf0]  ;;  %v3646_v22 = vld [vmem:[#allocation8 + $0xb4] sm:$0xf]  ;;  %v3349_v51 = vld [vmem:[#allocation8 + $0x160] sm:$0xf] }
  0xe2   :  { %1738 = vmatpush.bf16.msra.mxu2 %v2926_v32  ;;  %1753 = vmatpush.bf16.msrb.mxu0 %v3038_v36  ;;  %v3245_v32 = vld [vmem:[#allocation8 + $0x90] sm:$0xf]  ;;  %v3234_v36 = vor.u32 %v3638_v29, %v3231_v30  ;;  %v3671_v29 = vld [vmem:[#allocation8 + $0x174] sm:$0xf0] }
  0xe4   :  { %2193 = vmatpush.bf16.msra.mxu3 %v3222_v33  ;;  %2206 = vmatpush.bf16.msrb.mxu1 %v3294_v47  ;;  %v3643_v33 = vld [vmem:[#allocation8 + $0x94] sm:$0xf0] }
  0xe5   :  { %1754 = vmatmul.bf16.vlgmr.msrb.gmra.mxu0 %v3914_v24  ;;  %v3189_v24 = vld [vmem:[#allocation8 + $0x20] sm:$0xf]  ;;  %v3246_v39 = vor.u32 %v3643_v33, %v3245_v32 }
  0xe6   :  { %1739 = vmatpush.bf16.msra.mxu2 %v2910_v38  ;;  %v1475_v20 = vpop.f32.mrf.mxu2  ;;  %v1489_v41 = vpop.f32.mrf.mxu3 }
  0xe7   :  { %v1490_v6 = vadd.f32 %v1489_v41, %v391_v59 }
  0xe8   :  { %2194 = vmatpush.bf16.msra.mxu3 %v3214_v25  ;;  %2207 = vmatpush.bf16.msrb.mxu1 %v3286_v26  ;;  %v1447_v17 = vpop.f32.mrf.mxu0  ;;  %v1461_v18 = vpop.f32.mrf.mxu1  ;;  %v3226_v25 = vor.u32 %v3636_v42, %v3223_v43  ;;  %v3238_v26 = vor.u32 %v3641_v49, %v3237_v48  ;;  %v3644_v42 = vld [vmem:[#allocation8 + $0xa4] sm:$0xf]  ;;  %v3255_v43 = vld [vmem:[#allocation8 + $0xa8] sm:$0xf0]  ;;  %v3642_v49 = vld [vmem:[#allocation8 + $0x94] sm:$0xf] }
  0xe9   :  { %1740 = vmatmul.bf16.vlgmr.msra.gmra.mxu2 %v3912_v23  ;;  %v3190_v23 = vor.u32 %v3629_v2, %v3189_v24  ;;  %v1448_v19 = vadd.f32 %v1447_v17, %v1434_v12 }
  0xeb   :  { %v1462_v34 = vadd.f32 %v1461_v18, %v1448_v19  ;;  %v3628_v18 = vld [vmem:[#allocation8 + $0x24] sm:$0xf]  ;;  %v3191_v19 = vld [vmem:[#allocation8 + $0x28] sm:$0xf0] }
  0xec   :  { %2195 = vmatpush.bf16.msra.mxu3 %v3206_v55  ;;  %2208 = vmatpush.bf16.msrb.mxu1 %v3278_v58  ;;  %v3287_v55 = vld [vmem:[#allocation8 + $0xe8] sm:$0xf0]  ;;  %v3298_v58 = vor.u32 %v3654_v52, %v3295_v53  ;;  %v3194_v32 = vor.u32 %v3628_v18, %v3191_v19  ;;  %v3669_v52 = vld [vmem:[#allocation8 + $0x164] sm:$0xf0] }
  0xed   :  { %v1476_v46 = vadd.f32 %v1475_v20, %v1462_v34  ;;  %v3290_v0 = vor.u32 %v3652_v54, %v3287_v55  ;;  %v3274_v20 = vor.u32 %v3648_v13, %v3271_v14 }
  0xee   :  { %v1477_v47 = vpop.f32.mrf.mxu2 }
  0xef   :  { %3170 = vmatmul.msk.bf16.vlgmr.msra.gmra.mxu1 %vm1378_vm0, %v3908_v3  ;;  %v3254_v3 = vor.u32 %v3645_v16, %v3253_v15  ;;  %v1782_v56 = vmul.f32 0.2, %v1476_v46  ;;  %vm1774_vm1 = vcmp.gt.f32.partialorder %v1476_v46, 0.0  ;;  %v3202_v16 = vor.u32 %v3630_v8, %v3199_v9  ;;  %v3325_v8 = vld [vmem:[#allocation8 + $0x130] sm:$0xf] }
  0xf0   :  { %2196 = vmatpush.bf16.msra.mxu3 %v3198_v1  ;;  %2209 = vmatpush.bf16.msrb.mxu1 %v3270_v4  ;;  %v1449_v44 = vpop.f32.mrf.mxu0  ;;  %v1463_v45 = vpop.f32.mrf.mxu1  ;;  %vm2374_vm0 = vcmask 122880  }
  0xf1   :  { %v1450_v38 = vadd.f32 %v1449_v44, %v1436_v40  ;;  %v1790_v1 = vsel %vm1774_vm1, %v1476_v46, %v1782_v56  ;;  %v1491_v4 = vpop.f32.mrf.mxu3  ;;  %v3266_v40 = vor.u32 %v3646_v22, %v3263_v27  ;;  %v3624_v46 = vld [vmem:[#allocation8 + $0x4] sm:$0xf]  ;;  %v3350_v56 = vor.u32 %v3669_v52, %v3349_v51 }
  0xf3   :  { %v1464_v50 = vadd.f32 %v1463_v45, %v1450_v38  ;;  %v3175_v38 = vld [vmem:[#allocation8 + $0x8] sm:$0xf0] }
  0xf4   :  { %2197 = vmatpush.bf16.msra.mxu3 %v3190_v23  ;;  %2210 = vmatpush.bf16.msrb.mxu1 %v3262_v11  ;;  %v3279_v11 = vld [vmem:[#allocation8 + $0xd8] sm:$0xf0] }
  0xf5   :  { %v1478_v57 = vadd.f32 %v1477_v47, %v1464_v50  ;;  %v3282_v12 = vor.u32 %v3650_v10, %v3279_v11  ;;  %v3258_v47 = vor.u32 %v3644_v42, %v3255_v43  ;;  %v3247_v50 = vld [vmem:[#allocation8 + $0x98] sm:$0xf0]  ;;  %v392_v42 = vperm.slane %v3935_v31, 2  ;;  %v3421_v43 = vld [vmem:[#allocation8 + $0x1f0] sm:$0xf] }
  0xf6   :  { %v1503_v2 = vpop.f32.mrf.mxu2  ;;  %v3250_v55 = vor.u32 %v3642_v49, %v3247_v50  ;;  %v3664_v49 = vld [vmem:[#allocation8 + $0x144] sm:$0xf]  ;;  %v3335_v50 = vld [vmem:[#allocation8 + $0x148] sm:$0xf0] }
  0xf7   :  { %vm1778_vm2 = vcmp.gt.f32.partialorder %v1478_v57, 0.0  ;;  %v1786_v62 = vmul.f32 0.2, %v1478_v57  ;;  %v1504_v15 = vadd.f32 %v1503_v2, %v1490_v6  ;;  %v3333_v2 = vld [vmem:[#allocation8 + $0x140] sm:$0xf]  ;;  %v3338_v52 = vor.u32 %v3664_v49, %v3335_v50 }
  0xf8   :  { %2198 = vmatpush.bf16.msra.mxu3 %v3182_v21  ;;  %2211 = vmatpush.bf16.msrb.mxu1 %v3254_v3  ;;  %v1492_v21 = vadd.f32 %v1491_v4, %v391_v59  ;;  %v3357_v3 = vld [vmem:[#allocation8 + $0x170] sm:$0xf]  ;;  %v3665_v4 = vld [vmem:[#allocation8 + $0x144] sm:$0xf0] }
  0xf9   :  { %v1794_v24 = vsel %vm1778_vm2, %v1478_v57, %v1786_v62  ;;  %v3358_v33 = vor.u32 %v3671_v29, %v3357_v3  ;;  %v3341_v57 = vld [vmem:[#allocation8 + $0x150] sm:$0xf]  ;;  %v3301_v3 = vld [vmem:[#allocation8 + $0x100] sm:$0xf]  ;;  %v3670_v29 = vld [vmem:[#allocation8 + $0x174] sm:$0xf] }
  0xfa   :  { %v3945_v5 = vpack.c.bf16 %v1794_v24, %v1790_v1  ;;  %v1517_v23 = vpop.f32.mrf.mxu0 }
  0xfb   :  { %v1518_v30 = vadd.f32 %v1517_v23, %v1504_v15  ;;  %2220 = vmatpush.bf16.msrb.mxu2 %v3358_v33  ;;  %v3663_v23 = vld [vmem:[#allocation8 + $0x134] sm:$0xf0]  ;;  %v3317_v15 = vld [vmem:[#allocation8 + $0x120] sm:$0xf]  ;;  %v3359_v33 = vld [vmem:[#allocation8 + $0x178] sm:$0xf0] }
  0xfc   :  { %2199 = vmatpush.bf16.msra.mxu3 %v3174_v35  ;;  %2212 = vmatpush.bf16.msrb.mxu1 %v3246_v39  ;;  %v1531_v17 = vpop.f32.mrf.mxu1  ;;  %v3183_v39 = vld [vmem:[#allocation8 + $0x18] sm:$0xf0] }
  0xfd   :  { %v1532_v44 = vadd.f32 %v1531_v17, %v1518_v30 }
  0xfe   :  { %v1505_v28 = vpop.f32.mrf.mxu2 }
  0xff   :  { %2200 = vmatmul.bf16.vlgmr.msra.gmra.mxu3 %v3945_v5  ;;  %v1506_v41 = vadd.f32 %v1505_v28, %v1492_v21  ;;  %2221 = vmatpush.bf16.msrb.mxu2 %v3350_v56  ;;  %v3659_v21 = vld [vmem:[#allocation8 + $0x114] sm:$0xf0]  ;;  %v3657_v28 = vld [vmem:[#allocation8 + $0x104] sm:$0xf0]  ;;  %v3327_v56 = vld [vmem:[#allocation8 + $0x138] sm:$0xf0] }
 0x100   :  { %2248 = vmatpush.bf16.msrb.mxu3 %v3234_v36  ;;  %2213 = vmatpush.bf16.msrb.mxu1 %v3238_v26  ;;  %v3626_v36 = vld [vmem:[#allocation8 + $0x14] sm:$0xf]  ;;  %v3178_v26 = vor.u32 %v3624_v46, %v3175_v38  ;;  %v3343_v38 = vld [vmem:[#allocation8 + $0x158] sm:$0xf0] }
 0x101   :  { %v3186_v45 = vor.u32 %v3626_v36, %v3183_v39  ;;  %v3362_v36 = vor.u32 %v3670_v29, %v3359_v33  ;;  %v3666_v46 = vld [vmem:[#allocation8 + $0x154] sm:$0xf] }
 0x102   :  { %v1545_v34 = vpop.f32.mrf.mxu3  ;;  %v1519_v35 = vpop.f32.mrf.mxu0 }
 0x103   :  { %v1546_v37 = vadd.f32 %v1545_v34, %v1532_v44  ;;  %v3668_v34 = vld [vmem:[#allocation8 + $0x164] sm:$0xf]  ;;  %v3687_v44 = vld [vmem:[#allocation8 + $0x1f4] sm:$0xf0] }
 0x104   :  { %2249 = vmatpush.bf16.msrb.mxu3 %v3226_v25  ;;  %2262 = vmatpush.bf16.msra.mxu1 %v3298_v58  ;;  %v1520_v25 = vadd.f32 %v1519_v35, %v1506_v41  ;;  %v1533_v48 = vpop.f32.mrf.mxu1  ;;  %v3667_v58 = vld [vmem:[#allocation8 + $0x154] sm:$0xf0]  ;;  %v3351_v35 = vld [vmem:[#allocation8 + $0x168] sm:$0xf0] }
 0x105   :  { %v3342_v63 = vor.u32 %v3667_v58, %v3341_v57 }
 0x106   :  { %v1534_v59 = vadd.f32 %v1533_v48, %v1520_v25  ;;  %v3346_v25 = vor.u32 %v3666_v46, %v3343_v38  ;;  %v3685_v48 = vld [vmem:[#allocation8 + $0x1e4] sm:$0xf0]  ;;  %v3365_v46 = vld [vmem:[#allocation8 + $0x180] sm:$0xf] }
 0x107   :  { %2222 = vmatpush.bf16.msrb.mxu2 %v3342_v63  ;;  %v3673_v38 = vld [vmem:[#allocation8 + $0x184] sm:$0xf0] }
 0x108   :  { %2250 = vmatpush.bf16.msrb.mxu3 %v3218_v60  ;;  %2263 = vmatpush.bf16.msra.mxu1 %v3290_v0  ;;  %v3640_v60 = vld [vmem:[#allocation8 + $0x84] sm:$0xf]  ;;  %v3366_v50 = vor.u32 %v3673_v38, %v3365_v46 }
 0x109   :  { %v3242_v1 = vor.u32 %v3640_v60, %v3239_v61  ;;  %v3397_v61 = vld [vmem:[#allocation8 + $0x1c0] sm:$0xf] }
 0x10a   :  { %v1573_v54 = vpop.f32.mrf.mxu0  ;;  %v1547_v62 = vpop.f32.mrf.mxu3 }
 0x10b   :  { %v1548_v24 = vadd.f32 %v1547_v62, %v1534_v59  ;;  %v3681_v62 = vld [vmem:[#allocation8 + $0x1c4] sm:$0xf0] }
 0x10c   :  { %2251 = vmatpush.bf16.msrb.mxu3 %v3210_v7  ;;  %2264 = vmatpush.bf16.msra.mxu1 %v3282_v12  ;;  %v1559_v53 = vpop.f32.mrf.mxu2  ;;  %v3334_v7 = vor.u32 %v3665_v4, %v3333_v2  ;;  %v3326_v12 = vor.u32 %v3663_v23, %v3325_v8  ;;  %v3389_v23 = vld [vmem:[#allocation8 + $0x1b0] sm:$0xf] }
 0x10d   :  { %v1560_v0 = vadd.f32 %v1559_v53, %v1546_v37  ;;  %v3405_v53 = vld [vmem:[#allocation8 + $0x1d0] sm:$0xf] }
 0x10e   :  { %2223 = vmatpush.bf16.msrb.mxu2 %v3334_v7 }
 0x10f   :  { %v1574_v6 = vadd.f32 %v1573_v54, %v1560_v0  ;;  %v3683_v54 = vld [vmem:[#allocation8 + $0x1d4] sm:$0xf0] }
 0x110   :  { %2252 = vmatpush.bf16.msrb.mxu3 %v3202_v16  ;;  %2265 = vmatpush.bf16.msra.mxu1 %v3274_v20  ;;  %v3661_v16 = vld [vmem:[#allocation8 + $0x124] sm:$0xf0]  ;;  %v3309_v20 = vld [vmem:[#allocation8 + $0x110] sm:$0xf]  ;;  %v3406_v58 = vor.u32 %v3683_v54, %v3405_v53 }
 0x111   :  { %v1783_v13 = vmul.f32 0.2, %v1574_v6  ;;  %vm1775_vm3 = vcmp.gt.f32.partialorder %v1574_v6, 0.0  ;;  %v3318_v17 = vor.u32 %v3661_v16, %v3317_v15  ;;  %v3310_v27 = vor.u32 %v3659_v21, %v3309_v20  ;;  %v3303_v20 = vld [vmem:[#allocation8 + $0x108] sm:$0xf0] }
 0x112   :  { %v1575_v10 = vpop.f32.mrf.mxu0  ;;  %2224 = vmatpush.bf16.msrb.mxu2 %v3326_v12 }
 0x113   :  { %v1791_v18 = vsel %vm1775_vm3, %v1574_v6, %v1783_v13  ;;  %v3398_v6 = vor.u32 %v3681_v62, %v3397_v61  ;;  %v3680_v61 = vld [vmem:[#allocation8 + $0x1c4] sm:$0xf]  ;;  %v3399_v62 = vld [vmem:[#allocation8 + $0x1c8] sm:$0xf0] }
 0x114   :  { %2253 = vmatpush.bf16.msrb.mxu3 %v3194_v32  ;;  %2266 = vmatpush.bf16.msra.mxu1 %v3266_v40  ;;  %v1561_v9 = vpop.f32.mrf.mxu2  ;;  %v3302_v32 = vor.u32 %v3657_v28, %v3301_v3  ;;  %v3354_v40 = vor.u32 %v3668_v34, %v3351_v35 }
 0x115   :  { %v1562_v11 = vadd.f32 %v1561_v9, %v1548_v24  ;;  %v3319_v24 = vld [vmem:[#allocation8 + $0x128] sm:$0xf0]  ;;  %v3679_v9 = vld [vmem:[#allocation8 + $0x1b4] sm:$0xf0] }
 0x116   :  { %2225 = vmatpush.bf16.msrb.mxu2 %v3318_v17  ;;  %v3677_v17 = vld [vmem:[#allocation8 + $0x1a4] sm:$0xf0] }
 0x117   :  { %v1576_v14 = vadd.f32 %v1575_v10, %v1562_v11  ;;  %v3658_v10 = vld [vmem:[#allocation8 + $0x114] sm:$0xf]  ;;  %v3311_v11 = vld [vmem:[#allocation8 + $0x118] sm:$0xf0] }
 0x118   :  { %2254 = vmatpush.bf16.msrb.mxu3 %v3186_v45  ;;  %2267 = vmatpush.bf16.msra.mxu1 %v3258_v47  ;;  %v3422_v45 = vor.u32 %v3687_v44, %v3421_v43  ;;  %v3413_v47 = vld [vmem:[#allocation8 + $0x1e0] sm:$0xf]  ;;  %v3314_v16 = vor.u32 %v3658_v10, %v3311_v11  ;;  %v3383_v10 = vld [vmem:[#allocation8 + $0x1a8] sm:$0xf0] }
 0x119   :  { %vm1779_vm4 = vcmp.gt.f32.partialorder %v1576_v14, 0.0  ;;  %v3414_v37 = vor.u32 %v3685_v48, %v3413_v47  ;;  %v3686_v47 = vld [vmem:[#allocation8 + $0x1f4] sm:$0xf] }
 0x11a   :  { %2226 = vmatpush.bf16.msrb.mxu2 %v3310_v27  ;;  %2234 = vmatpush.bf16.msra.mxu0 %v3422_v45 }
 0x11c   :  { %2255 = vmatpush.bf16.msrb.mxu3 %v3178_v26  ;;  %2268 = vmatpush.bf16.msra.mxu1 %v3250_v55  ;;  %v1587_v30 = vpop.f32.mrf.mxu1  ;;  %v3662_v55 = vld [vmem:[#allocation8 + $0x134] sm:$0xf] }
 0x11d   :  { %v1588_v26 = vadd.f32 %v1587_v30, %v392_v42  ;;  %v3330_v60 = vor.u32 %v3662_v55, %v3327_v56 }
 0x11e   :  { %2227 = vmatpush.bf16.msrb.mxu2 %v3302_v32  ;;  %v1615_v39 = vpop.f32.mrf.mxu0  ;;  %2235 = vmatpush.bf16.msra.mxu0 %v3414_v37  ;;  %v3684_v37 = vld [vmem:[#allocation8 + $0x1e4] sm:$0xf] }
 0x11f   :  { %2256 = vmatmul.bf16.vlgmr.msrb.gmra.mxu3 %v3945_v5  ;;  %v1787_v5 = vmul.f32 0.2, %v1576_v14 }
 0x120   :  { %2269 = vmatpush.bf16.msra.mxu1 %v3242_v1  ;;  %v3660_v1 = vld [vmem:[#allocation8 + $0x124] sm:$0xf] }
 0x121   :  { %v1795_v19 = vsel %vm1779_vm4, %v1576_v14, %v1787_v5  ;;  %v3322_v8 = vor.u32 %v3660_v1, %v3319_v24  ;;  %v3390_v14 = vor.u32 %v3679_v9, %v3389_v23  ;;  %v3381_v5 = vld [vmem:[#allocation8 + $0x1a0] sm:$0xf]  ;;  %v3678_v24 = vld [vmem:[#allocation8 + $0x1b4] sm:$0xf]  ;;  %v3676_v9 = vld [vmem:[#allocation8 + $0x1a4] sm:$0xf] }
 0x122   :  { %v1799_v22 = vpack.c.bf16 %v1795_v19, %v1791_v18  ;;  %2276 = vmatpush.bf16.msra.mxu2 %v3362_v36  ;;  %v1601_v41 = vpop.f32.mrf.mxu3  ;;  %2236 = vmatpush.bf16.msra.mxu0 %v3406_v58  ;;  %v3656_v19 = vld [vmem:[#allocation8 + $0x104] sm:$0xf]  ;;  %v3382_v3 = vor.u32 %v3677_v17, %v3381_v5  ;;  %v3373_v36 = vld [vmem:[#allocation8 + $0x190] sm:$0xf]  ;;  %v3407_v58 = vld [vmem:[#allocation8 + $0x1d8] sm:$0xf0] }
 0x123   :  { %v1602_v59 = vadd.f32 %v1601_v41, %v1588_v26  ;;  %v3306_v29 = vor.u32 %v3656_v19, %v3303_v20  ;;  %v3415_v26 = vld [vmem:[#allocation8 + $0x1e8] sm:$0xf0] }
 0x124   :  { %2214 = vmatmul.bf16.vlgmr.msrb.gmra.mxu1 %v1799_v22  ;;  %v1589_v51 = vpop.f32.mrf.mxu1  ;;  %v3418_v54 = vor.u32 %v3684_v37, %v3415_v26 }
 0x125   :  { %v1590_v2 = vadd.f32 %v1589_v51, %v392_v42  ;;  %v1616_v7 = vadd.f32 %v1615_v39, %v1602_v59  ;;  %v3675_v39 = vld [vmem:[#allocation8 + $0x194] sm:$0xf0]  ;;  %v393_v59 = vperm.slane %v3935_v31, 3 }
 0x126   :  { %2277 = vmatpush.bf16.msra.mxu2 %v3354_v40  ;;  %v1617_v57 = vpop.f32.mrf.mxu0  ;;  %2237 = vmatpush.bf16.msra.mxu0 %v3398_v6  ;;  %v3374_v41 = vor.u32 %v3675_v39, %v3373_v36 }
 0x12a   :  { %2278 = vmatpush.bf16.msra.mxu2 %v3346_v25  ;;  %v1603_v0 = vpop.f32.mrf.mxu3  ;;  %2238 = vmatpush.bf16.msra.mxu0 %v3390_v14  ;;  %v3423_v25 = vld [vmem:[#allocation8 + $0x1f8] sm:$0xf0] }
 0x12b   :  { %v1604_v12 = vadd.f32 %v1603_v0, %v1590_v2  ;;  %v3426_v51 = vor.u32 %v3686_v47, %v3423_v25  ;;  %v3391_v2 = vld [vmem:[#allocation8 + $0x1b8] sm:$0xf0]  ;;  %v1866_v25 = vld [vmem:[%s3964_s4] sm:$0x3] }
 0x12c   :  { %v1629_v63 = vpop.f32.mrf.mxu2  ;;  %v3375_v14 = vld [vmem:[#allocation8 + $0x198] sm:$0xf0] }
 0x12d   :  { %v1630_v15 = vadd.f32 %v1629_v63, %v1616_v7  ;;  %v1618_v21 = vadd.f32 %v1617_v57, %v1604_v12  ;;  %v3682_v57 = vld [vmem:[#allocation8 + $0x1d4] sm:$0xf]  ;;  %v3402_v63 = vor.u32 %v3680_v61, %v3399_v62  ;;  %v3386_v12 = vor.u32 %v3676_v9, %v3383_v10 }
 0x12e   :  { %2279 = vmatpush.bf16.msra.mxu2 %v3338_v52  ;;  %v1671_v13 = vpop.f32.mrf.mxu0  ;;  %2239 = vmatpush.bf16.msra.mxu0 %v3382_v3  ;;  %v3367_v3 = vld [vmem:[#allocation8 + $0x188] sm:$0xf0] }
 0x132   :  { %2280 = vmatpush.bf16.msra.mxu2 %v3330_v60  ;;  %2240 = vmatpush.bf16.msra.mxu0 %v3374_v41  ;;  %v3410_v60 = vor.u32 %v3682_v57, %v3407_v58 }
 0x134   :  { %2270 = vmatmul.bf16.vlgmr.msra.gmra.mxu1 %v1799_v22  ;;  %v1631_v27 = vpop.f32.mrf.mxu2 }
 0x135   :  { %v1632_v32 = vadd.f32 %v1631_v27, %v1618_v21  ;;  %v3672_v27 = vld [vmem:[#allocation8 + $0x184] sm:$0xf] }
 0x136   :  { %2281 = vmatpush.bf16.msra.mxu2 %v3322_v8  ;;  %v1673_v35 = vpop.f32.mrf.mxu0  ;;  %2241 = vmatpush.bf16.msra.mxu0 %v3366_v50  ;;  %v3394_v8 = vor.u32 %v3678_v24, %v3391_v2  ;;  %v2316_v24 = vld [vmem:[#allocation10] sm:$0xff] }
 0x13a   :  { %2282 = vmatpush.bf16.msra.mxu2 %v3314_v16  ;;  %2290 = vmatpush.bf16.msrb.mxu0 %v3426_v51 }
 0x13c   :  { %v1643_v4 = vpop.f32.mrf.mxu1 }
 0x13d   :  { %v1644_v22 = vadd.f32 %v1643_v4, %v1630_v15 }
 0x13e   :  { %2283 = vmatpush.bf16.msra.mxu2 %v3306_v29  ;;  %2291 = vmatpush.bf16.msrb.mxu0 %v3418_v54  ;;  %v3370_v29 = vor.u32 %v3672_v27, %v3367_v3  ;;  %v2321_v3 = vunpack.c.h.b16 %v2316_v24 }
 0x142   :  { %v1657_v18 = vpop.f32.mrf.mxu3  ;;  %v1699_v53 = vpop.f32.mrf.mxu0  ;;  %2292 = vmatpush.bf16.msrb.mxu0 %v3410_v60 }
 0x143   :  { %v1658_v28 = vadd.f32 %v1657_v18, %v1644_v22 }
 0x144   :  { %v1645_v30 = vpop.f32.mrf.mxu1 }
 0x145   :  { %v1672_v33 = vadd.f32 %v1671_v13, %v1658_v28  ;;  %v1646_v34 = vadd.f32 %v1645_v30, %v1632_v32  ;;  %v3674_v13 = vld [vmem:[#allocation8 + $0x194] sm:$0xf] }
 0x146   :  { %2293 = vmatpush.bf16.msrb.mxu0 %v3402_v63  ;;  %v3378_v18 = vor.u32 %v3674_v13, %v3375_v14 }
 0x147   :  { %v1784_v43 = vmul.f32 0.2, %v1672_v33  ;;  %vm1776_vm5 = vcmp.gt.f32.partialorder %v1672_v33, 0.0 }
 0x149   :  { %v1792_v48 = vsel %vm1776_vm5, %v1672_v33, %v1784_v43 }
 0x14a   :  { %v1659_v40 = vpop.f32.mrf.mxu3  ;;  %v1701_v1 = vpop.f32.mrf.mxu0  ;;  %2294 = vmatpush.bf16.msrb.mxu0 %v3394_v8  ;;  %v2320_v8 = vunpack.c.l.b16 %v2316_v24 }
 0x14b   :  { %v1660_v42 = vadd.f32 %v1659_v40, %v1646_v34 }
 0x14c   :  { %v1685_v55 = vpop.f32.mrf.mxu2  ;;  %v2322_v13 = vpack.c.b16 %v2320_v8, %v2320_v8 }
 0x14d   :  { %v1674_v44 = vadd.f32 %v1673_v35, %v1660_v42  ;;  %v1686_v0 = vadd.f32 %v1685_v55, %v393_v59 }
 0x14e   :  { %2295 = vmatpush.bf16.msrb.mxu0 %v3386_v12 }
 0x14f   :  { %vm1780_vm6 = vcmp.gt.f32.partialorder %v1674_v44, 0.0  ;;  %v1788_v45 = vmul.f32 0.2, %v1674_v44  ;;  %v1700_v23 = vadd.f32 %v1699_v53, %v1686_v0  ;;  %v1869_v0 = vperm.slane %v1866_v25, 1 }
 0x151   :  { %v1796_v49 = vsel %vm1780_vm6, %v1674_v44, %v1788_v45 }
 0x152   :  { %v1800_v52 = vpack.c.bf16 %v1796_v49, %v1792_v48  ;;  %2296 = vmatpush.bf16.msrb.mxu0 %v3378_v18  ;;  %v1868_v48 = vperm.slane %v1866_v25, 0 }
 0x154   :  { %2228 = vmatmul.bf16.vlgmr.msrb.gmra.mxu2 %v1800_v52  ;;  %v1687_v4 = vpop.f32.mrf.mxu2 }
 0x155   :  { %v1688_v31 = vadd.f32 %v1687_v4, %v393_v59 }
 0x156   :  { %2297 = vmatpush.bf16.msrb.mxu0 %v3370_v29 }
 0x157   :  { %v1702_v19 = vadd.f32 %v1701_v1, %v1688_v31 }
 0x15c   :  { %v1713_v56 = vpop.f32.mrf.mxu1 }
 0x15d   :  { %v1714_v11 = vadd.f32 %v1713_v56, %v1700_v23 }
 0x162   :  { %v1727_v6 = vpop.f32.mrf.mxu3  ;;  %v1755_v16 = vpop.f32.mrf.mxu0 }
 0x163   :  { %v1728_v15 = vadd.f32 %v1727_v6, %v1714_v11 }
 0x164   :  { %v1715_v7 = vpop.f32.mrf.mxu1  ;;  %2284 = vmatmul.bf16.vlgmr.msra.gmra.mxu2 %v1800_v52 }
 0x165   :  { %v1716_v21 = vadd.f32 %v1715_v7, %v1702_v19 }
 0x16a   :  { %v1729_v20 = vpop.f32.mrf.mxu3  ;;  %v1757_v35 = vpop.f32.mrf.mxu0 }
 0x16b   :  { %v1730_v28 = vadd.f32 %v1729_v20, %v1716_v21 }
 0x16c   :  { %v1741_v5 = vpop.f32.mrf.mxu2  ;;  %v1769_v17 = vpop.f32.mrf.mxu1 }
 0x16d   :  { %v1742_v22 = vadd.f32 %v1741_v5, %v1728_v15 }
 0x16f   :  { %v1756_v30 = vadd.f32 %v1755_v16, %v1742_v22 }
 0x171   :  { %v1770_v33 = vadd.f32 %v1769_v17, %v1756_v30 }
 0x173   :  { %v1785_v40 = vmul.f32 0.2, %v1770_v33  ;;  %vm1777_vm7 = vcmp.gt.f32.partialorder %v1770_v33, 0.0 }
 0x174   :  { %v1743_v32 = vpop.f32.mrf.mxu2  ;;  %v1771_v36 = vpop.f32.mrf.mxu1 }
 0x175   :  { %v1744_v34 = vadd.f32 %v1743_v32, %v1730_v28  ;;  %v1793_v43 = vsel %vm1777_vm7, %v1770_v33, %v1785_v40  ;;  %v2323_v28 = vpack.c.b16 %v2321_v3, %v2321_v3  ;;  %v2353_v33 = vstv %s3966_s6 }
 0x177   :  { %v1758_v39 = vadd.f32 %v1757_v35, %v1744_v34 }
 0x179   :  { %v1772_v41 = vadd.f32 %v1771_v36, %v1758_v39 }
 0x17b   :  { %vm1781_vm8 = vcmp.gt.f32.partialorder %v1772_v41, 0.0  ;;  %v1789_v42 = vmul.f32 0.2, %v1772_v41 }
 0x17d   :  { %v1797_v44 = vsel %vm1781_vm8, %v1772_v41, %v1789_v42 }
 0x17e   :  { %v1801_v45 = vpack.c.bf16 %v1797_v44, %v1793_v43 }
 0x180   :  { %2242 = vmatmul.bf16.vlgmr.msra.gmra.mxu0 %v1801_v45 }
 0x182   :  { %v2201_v46 = vpop.f32.mrf.mxu3 }
 0x183   :  { %v2202_v51 = vadd.f32 %v2201_v46, %v1868_v48 }
 0x18a   :  { %v2203_v49 = vpop.f32.mrf.mxu3 }
 0x18b   :  { %v2204_v53 = vadd.f32 %v2203_v49, %v1868_v48 }
 0x190   :  { %2298 = vmatmul.bf16.vlgmr.msrb.gmra.mxu0 %v1801_v45 }
 0x1a1   :  { %v2215_v38 = vpop.f32.mrf.mxu1 }
 0x1a2   :  { %v2216_v52 = vadd.f32 %v2215_v38, %v2202_v51  ;;  %v2257_v57 = vpop.f32.mrf.mxu3 }
 0x1a3   :  { %v2258_v7 = vadd.f32 %v2257_v57, %v1869_v0 }
 0x1a9   :  { %v2217_v50 = vpop.f32.mrf.mxu1 }
 0x1aa   :  { %v2218_v55 = vadd.f32 %v2217_v50, %v2204_v53  ;;  %v2259_v23 = vpop.f32.mrf.mxu3 }
 0x1ab   :  { %v2260_v11 = vadd.f32 %v2259_v23, %v1869_v0 }
 0x1b1   :  { %v2271_v59 = vpop.f32.mrf.mxu1 }
 0x1b2   :  { %v2272_v10 = vadd.f32 %v2271_v59, %v2258_v7 }
 0x1b9   :  { %v2273_v31 = vpop.f32.mrf.mxu1 }
 0x1ba   :  { %v2274_v15 = vadd.f32 %v2273_v31, %v2260_v11 }
 0x1d7   :  { %v2229_v47 = vpop.f32.mrf.mxu2 }
 0x1d8   :  { %v2230_v54 = vadd.f32 %v2229_v47, %v2216_v52 }
 0x1df   :  { %v2231_v37 = vpop.f32.mrf.mxu2 }
 0x1e0   :  { %v2232_v58 = vadd.f32 %v2231_v37, %v2218_v55 }
 0x1e7   :  { %v2285_v63 = vpop.f32.mrf.mxu2 }
 0x1e8   :  { %v2286_v12 = vadd.f32 %v2285_v63, %v2272_v10 }
 0x1ef   :  { %v2287_v14 = vpop.f32.mrf.mxu2 }
 0x1f0   :  { %v2288_v5 = vadd.f32 %v2287_v14, %v2274_v15 }
 0x1fd   :  { %v2243_v26 = vpop.f32.mrf.mxu0 }
 0x1fe   :  { %v2244_v56 = vadd.f32 %v2243_v26, %v2230_v54 }
 0x200   :  { %v2308_v61 = vmul.f32 0.2, %v2244_v56  ;;  %vm2304_vm9 = vcmp.gt.f32.partialorder %v2244_v56, 0.0 }
 0x202   :  { %v2312_v2 = vsel %vm2304_vm9, %v2244_v56, %v2308_v61 }
 0x205   :  { %v2245_v60 = vpop.f32.mrf.mxu0 }
 0x206   :  { %v2246_v62 = vadd.f32 %v2245_v60, %v2232_v58 }
 0x208   :  { %vm2306_vm10 = vcmp.gt.f32.partialorder %v2246_v62, 0.0  ;;  %v2310_v1 = vmul.f32 0.2, %v2246_v62 }
 0x20a   :  { %v2314_v4 = vsel %vm2306_vm10, %v2246_v62, %v2310_v1 }
 0x20b   :  { %v2317_v6 = vpack.c.bf16 %v2314_v4, %v2312_v2 }
 0x20d   :  { %v2299_v9 = vpop.f32.mrf.mxu0  ;;  %2333 = vmatpush.bf16.xpose.msra.mxu3 %v2317_v6 }
 0x20e   :  { %v2300_v16 = vadd.f32 %v2299_v9, %v2286_v12 }
 0x210   :  { %v2309_v18 = vmul.f32 0.2, %v2300_v16  ;;  %vm2305_vm11 = vcmp.gt.f32.partialorder %v2300_v16, 0.0 }
 0x212   :  { %v2313_v21 = vsel %vm2305_vm11, %v2300_v16, %v2309_v18 }
 0x214   :  { %2334 = vmatmul.bf16.vlgmr.msra.gmra.mxu3 %v2322_v13 }
 0x215   :  { %v2301_v17 = vpop.f32.mrf.mxu0 }
 0x216   :  { %v2302_v19 = vadd.f32 %v2301_v17, %v2288_v5 }
 0x218   :  { %vm2307_vm12 = vcmp.gt.f32.partialorder %v2302_v19, 0.0  ;;  %v2311_v20 = vmul.f32 0.2, %v2302_v19 }
 0x21a   :  { %v2315_v22 = vsel %vm2307_vm12, %v2302_v19, %v2311_v20 }
 0x21b   :  { %v2318_v27 = vpack.c.bf16 %v2315_v22, %v2313_v21 }
 0x21d   :  { %2346 = vmatpush.bf16.xpose.msrb.mxu1 %v2318_v27 }
 0x224   :  { %2347 = vmatmul.bf16.vlgmr.msrb.gmra.mxu1 %v2323_v28 }
 0x297   :  { %v2335_v29 = vpop.f32.mrf.mxu3 }
 0x29f   :  { %v2337_v30 = vpop.f32.mrf.mxu3 }
 0x2a1   :  { %v2348_v32 = vpop.f32.mrf.mxu1 }
 0x2a2   :  { %v2349_v34 = vadd.f32 %v2348_v32, %v2335_v29 }
 0x2a4   :  { %v2354_v35 = vadd.f32 %v2353_v33, %v2349_v34 }
 0x2a6   :  { %v3427_v36 = vmul.f32 -1.442695, %v2354_v35 }
 0x2a8   :  { %3699 = vpow2.f32 %v3427_v36 }
 0x2a9   :  { %v2350_v39 = vpop.f32.mrf.mxu1 }
 0x2ae   :  { %v3700_v40 = vpop.eup %3699 }
 0x2af   :  { %v2358_v41 = vadd.f32 1.0, %v3700_v40 }
 0x2b1   :  { %3701 = vrcp.f32 %v2358_v41  ;;  %v2370_v45 = vand.u32 2147483648, %v2358_v41  ;;  %v2368_v38 = vand.u32 2147483647, %v2358_v41  ;;  %vm2364_vm14 = vweird.f32 %v2358_v41 }
 0x2b3   :  { %v2371_v25 = vor.u32 1.1754944e-38, %v2370_v45  ;;  %vm2369_vm1 = vcmp.eq.f32.partialorder %v2368_v38, 8.507059e+37 }
 0x2b7   :  { %v3702_v42 = vpop.eup %3701 }
 0x2b8   :  { %v2360_v43 = vmul.f32 %v3702_v42, %v2358_v41  ;;  %vm2365_vm13 = vweird.f32 %v3702_v42 }
 0x2b9   :  { %vm2366_vm15 = vmor %vm2364_vm14, %vm2365_vm13 }
 0x2ba   :  { %v2361_v44 = vsub.f32 1.0, %v2360_v43 }
 0x2bc   :  { %v2362_v46 = vmul.f32 %v3702_v42, %v2361_v44 }
 0x2be   :  { %v2363_v47 = vadd.f32 %v3702_v42, %v2362_v46 }
 0x2c0   :  { %v2367_v48 = vsel %vm2366_vm15, %v3702_v42, %v2363_v47 }
 0x2c1   :  { %v2372_v49 = vsel %vm2369_vm1, %v2371_v25, %v2367_v48 }
 0x2c2   :  { %2375 = vst.msk [vmem:[%s3967_s7] sm:$0x1] %vm2374_vm0, %v2372_v49 }
 0x2c3   :  { %2380 = vsyncpa [#allocation4], 1 }
 0x2c4   :  { %2381 = vsyncpa [#allocation6], 1 }
 0x2c5   :  { %2382 = vsyncpa [#allocation9], 1 }

</bundles_post_ra>
